<compile_context>
chip_gen: v5e
topology: v5e:2x2
jax: 0.10.0
libtpu: 0.0.40
codegen_flags: <defaults>
</compile_context>

<pallas_src>
import jax
import jax.numpy as jnp
from jax import lax
from jax.experimental import pallas as pl
from jax.experimental.pallas import tpu as pltpu

EPS = 1e-5                 # PyTorch BatchNorm2d default eps
MM_DTYPE = jnp.float32     # set to jnp.bfloat16 on v5e/v6e/v7x in production
TH_MAX = 32                # cap on output rows per tile (VMEM budget)


def _round_up(x, m):
    return (x + m - 1) // m * m


def _pick_th(h):
    """Largest divisor of h that is <= TH_MAX (output rows per tile)."""
    for th in range(min(h, TH_MAX), 0, -1):
        if h % th == 0:
            return th
    return h


# --------------------------- Pallas kernel ----------------------------------
def _make_conv_block_kernel(seg_ch_pad, c_out, wp, L_in, L_out, L_stage):
    """Fused BN(scale/shift)+ReLU staging + 3x3 'same' conv on one row-tile."""
    n_seg = len(seg_ch_pad)
    offs = [sum(seg_ch_pad[:s]) for s in range(n_seg)]
    c_total_pad = sum(seg_ch_pad)

    def kernel(*args):
        seg_refs = args[:n_seg]
        mask_ref = args[n_seg]
        ss_refs = args[n_seg + 1: 3 * n_seg + 1]
        wt_ref = args[3 * n_seg + 1]
        b_ref = args[3 * n_seg + 2]
        o_ref = args[3 * n_seg + 3]
        stage = args[3 * n_seg + 4]

        # Zero the small lane slack past the staged tile so the (discarded) garbage
        # columns of the output stay finite and deterministic.
        stage[:, L_in:L_stage] = jnp.zeros((c_total_pad, L_stage - L_in), jnp.float32)

        mask = mask_ref[0]                                    # (1, L_in) interior mask
        # Stage BN+ReLU of every previously produced feature map into ONE shared
        # channel-major scratch (sublane-aligned, full-lane-width writes).
        for s in range(n_seg):
            x = seg_refs[s][0, 0]                             # (cs_pad, L_in)
            scale = ss_refs[2 * s][...]                       # (cs_pad, 1)
            shift = ss_refs[2 * s + 1][...]                   # (cs_pad, 1)
            a = jnp.maximum(x * scale + shift, 0.0) * mask    # BN + ReLU + zero ring
            stage[offs[s]:offs[s] + seg_ch_pad[s], :L_in] = a

        # 3x3 conv = 9 accumulated MXU dots on lane-shifted slices of the staged
        # activation; acc (c_out, th*Wp) is lane-dense, fp32 accumulation.
        acc = jnp.zeros((c_out, L_out), jnp.float32)
        for kh in range(3):
            for kw in range(3):
                tap = kh * 3 + kw
                d = kh * wp + kw
                w_tap = wt_ref[tap * c_out:(tap + 1) * c_out, :].astype(MM_DTYPE)
                rhs = stage[:, d:d + L_out].astype(MM_DTYPE)
                acc = acc + jnp.dot(w_tap, rhs, preferred_element_type=jnp.float32)
        acc = acc + b_ref[...]                                # (c_out, 1) broadcast
        o_ref[...] = acc.reshape(1, 1, c_out, L_out).astype(o_ref.dtype)

    return kernel


def _conv_block_apply(seg_tiles, seg_ch_pad, mask_tiles, scales, shifts, wt, bias,
                      n, n_h, wp, th, out_dtype):
    c_out = int(bias.shape[0])
    c_total_pad = sum(seg_ch_pad)
    L_in = (th + 2) * wp
    L_out = th * wp
    L_stage = _round_up(L_in + 8, 128)

    in_specs, inputs = [], []
    for t, cp in zip(seg_tiles, seg_ch_pad):
        in_specs.append(pl.BlockSpec((1, 1, cp, L_in), lambda ni, hi: (ni, hi, 0, 0)))
        inputs.append(t)
    in_specs.append(pl.BlockSpec((1, 1, L_in), lambda ni, hi: (hi, 0, 0)))
    inputs.append(mask_tiles)
    for sc, sh in zip(scales, shifts):
        in_specs.append(pl.BlockSpec(sc.shape, lambda ni, hi: (0, 0)))
        inputs.append(sc)
        in_specs.append(pl.BlockSpec(sh.shape, lambda ni, hi: (0, 0)))
        inputs.append(sh)
    in_specs.append(pl.BlockSpec(wt.shape, lambda ni, hi: (0, 0)))
    inputs.append(wt)
    in_specs.append(pl.BlockSpec(bias.shape, lambda ni, hi: (0, 0)))
    inputs.append(bias)

    kernel = _make_conv_block_kernel(seg_ch_pad, c_out, wp, L_in, L_out, L_stage)

    flops = 2 * n * n_h * 9 * c_total_pad * c_out * L_out
    bytes_accessed = 4 * (n * n_h * (c_total_pad + 1) * L_in
                          + n * n_h * c_out * L_out
                          + 9 * c_out * c_total_pad + 2 * c_total_pad + c_out)

    return pl.pallas_call(
        kernel,
        out_shape=jax.ShapeDtypeStruct((n, n_h, c_out, L_out), out_dtype),
        grid=(n, n_h),
        in_specs=in_specs,
        out_specs=pl.BlockSpec((1, 1, c_out, L_out), lambda ni, hi: (ni, hi, 0, 0)),
        scratch_shapes=[pltpu.VMEM((c_total_pad, L_stage), jnp.float32)],
        compiler_params=pltpu.CompilerParams(
            dimension_semantics=("parallel", "parallel"),    # batch x h-tiles (megacore)
            vmem_limit_bytes=32 * 1024 * 1024),              # well under v7x's 64 MiB/TC
        cost_estimate=pl.CostEstimate(flops=flops, transcendentals=0,
                                      bytes_accessed=bytes_accessed),
    )(*inputs)


# --------------------------- wrapper / forward -------------------------------
def _channel_stats(x_nchw):
    # Per-channel batch statistics (biased variance) = PyTorch BN training mode.
    mean = jnp.mean(x_nchw, axis=(0, 2, 3))
    var = jnp.var(x_nchw, axis=(0, 2, 3))
    return mean, var


def _prep_segment(y_nchw, th, wp):
    """NCHW -> channel-padded, spatially-padded, row-tiled (2-row halo), flattened."""
    n, c, h, _ = y_nchw.shape
    cp = _round_up(c, 8)
    yp = jnp.pad(y_nchw, ((0, 0), (0, cp - c), (1, 1), (1, 1)))   # (n, cp, h+2, w+2)
    n_h = h // th
    tiles = [yp[:, :, i * th:i * th + th + 2, :].reshape(n, cp, (th + 2) * wp)
             for i in range(n_h)]
    return jnp.stack(tiles, axis=1)                               # (n, n_h, cp, (th+2)*wp)


def _prep_mask(h, w, th, wp):
    m = jnp.pad(jnp.ones((h, w), jnp.float32), ((1, 1), (1, 1)))  # (h+2, w+2)
    n_h = h // th
    tiles = [m[i * th:i * th + th + 2, :].reshape(1, (th + 2) * wp) for i in range(n_h)]
    return jnp.stack(tiles, axis=0)                               # (n_h, 1, (th+2)*wp)


def _prep_weights(w_hwio, seg_channels, offs_pad, c_total_pad):
    """(3,3,Cin,Cout) HWIO -> (9*Cout, c_total_pad) with per-segment channel padding."""
    c_in, c_out = int(w_hwio.shape[2]), int(w_hwio.shape[3])
    w9 = w_hwio.reshape(9, c_in, c_out)
    wt = jnp.zeros((9, c_out, c_total_pad), jnp.float32)
    col = 0
    for s, cs in enumerate(seg_channels):
        blk = jnp.transpose(w9[:, col:col + cs, :], (0, 2, 1))    # (9, c_out, cs)
        wt = wt.at[:, :, offs_pad[s]:offs_pad[s] + cs].set(blk)
        col += cs
    return wt.reshape(9 * c_out, c_total_pad)


def dense_block_forward(x_nchw, params):
    """DenseBlock.forward: X = cat([X, blk(X)], dim=1) for each conv_block (NCHW in/out)."""
    x = x_nchw.astype(jnp.float32)
    n, _, h, w = x.shape
    wp = w + 2
    th = _pick_th(h)
    n_h = h // th
    # TODO(synk): for very large images derive th from the VMEM budget instead of TH_MAX.

    segs = [x]                                  # produced feature maps, unpadded NCHW
    seg_tiles = [_prep_segment(x, th, wp)]      # kernel-ready padded / tiled copies
    stats = [_channel_stats(x)]                 # per-segment BN batch stats (computed once)
    mask_tiles = _prep_mask(h, w, th, wp)

    for gamma, beta, wconv, b in params:
        seg_channels = [int(s.shape[1]) for s in segs]
        seg_ch_pad = [_round_up(c, 8) for c in seg_channels]
        offs_pad = [sum(seg_ch_pad[:i]) for i in range(len(seg_ch_pad))]
        c_total_pad = sum(seg_ch_pad)
        c_out = int(wconv.shape[-1])

        mean = jnp.concatenate([m for m, _ in stats])
        var = jnp.concatenate([v for _, v in stats])
        scale = gamma.reshape(-1) * lax.rsqrt(var + EPS)     # fold BN into scale/shift
        shift = beta.reshape(-1) - mean * scale

        scales, shifts = [], []
        col = 0
        for cs, cp in zip(seg_channels, seg_ch_pad):
            sc = jnp.zeros((cp,), jnp.float32).at[:cs].set(scale[col:col + cs])
            sh = jnp.zeros((cp,), jnp.float32).at[:cs].set(shift[col:col + cs])
            scales.append(sc.reshape(cp, 1))
            shifts.append(sh.reshape(cp, 1))
            col += cs

        wt = _prep_weights(wconv, seg_channels, offs_pad, c_total_pad)
        bias = b.reshape(c_out, 1)

        y_tiles = _conv_block_apply(seg_tiles, seg_ch_pad, mask_tiles, scales, shifts,
                                    wt, bias, n, n_h, wp, th, x.dtype)
        # (n, n_h, c_out, th*wp) -> NCHW (drop the 2 padded columns per row)
        y = y_tiles.reshape(n, n_h, c_out, th, wp)
        y = jnp.transpose(y, (0, 2, 1, 3, 4)).reshape(n, c_out, h, wp)[:, :, :, :w]

        segs.append(y)
        seg_tiles.append(_prep_segment(y, th, wp))
        stats.append(_channel_stats(y))

    return jnp.concatenate(segs, axis=1)        # single dense concat, NCHW


def init_dense_block(key, num_convs, in_channels, out_channels):
    """PyTorch-default-like init: BN gamma=1, beta=0; Conv W/b ~ U(+-1/sqrt(fan_in))."""
    params = []
    for i in range(num_convs):
        in_c = in_channels + i * out_channels
        key, kw, kb = jax.random.split(key, 3)
        fan_in = in_c * 3 * 3
        bound = 1.0 / (fan_in ** 0.5)
        w = jax.random.uniform(kw, (3, 3, in_c, out_channels), jnp.float32,
                               minval=-bound, maxval=bound)  # HWIO
        b = jax.random.uniform(kb, (1, out_channels), jnp.float32,
                               minval=-bound, maxval=bound)
        gamma = jnp.ones((1, in_c), jnp.float32)
        beta = jnp.zeros((1, in_c), jnp.float32)
        params.append((gamma, beta, w, b))
    return params


# --------------------------- pure-JAX reference ------------------------------
def _conv_block_ref(x_nhwc, gamma, beta, w, b):
    x = x_nhwc.astype(jnp.float32)
    mean = jnp.mean(x, axis=(0, 1, 2), keepdims=True)
    var = jnp.mean((x - mean) ** 2, axis=(0, 1, 2), keepdims=True)
    a = (x - mean) * lax.rsqrt(var + EPS) * gamma.reshape(1, 1, 1, -1) \
        + beta.reshape(1, 1, 1, -1)
    a = jnp.maximum(a, 0.0)
    y = lax.conv_general_dilated(
        a, w, window_strides=(1, 1), padding="SAME",
        dimension_numbers=("NHWC", "HWIO", "NHWC"))
    return y + b.reshape(1, 1, 1, -1)


def _dense_block_ref(x_nchw, params):
    x = jnp.transpose(x_nchw, (0, 2, 3, 1))
    for gamma, beta, w, b in params:
        y = _conv_block_ref(x, gamma, beta, w, b)
        x = jnp.concatenate([x, y], axis=-1)
    return jnp.transpose(x, (0, 3, 1, 2))


if __name__ == "__main__":
    key = jax.random.PRNGKey(0)
    k_x, k_p = jax.random.split(key)

    # DenseBlock(num_convs=2, in_channels=4, out_channels=8)
    num_convs, in_channels, out_channels = 2, 4, 8
    x = jax.random.normal(k_x, (2, in_channels, 16, 16), jnp.float32)  # NCHW
    params = init_dense_block(k_p, num_convs, in_channels, out_channels)

    fwd = jax.jit(dense_block_forward)
    out = jax.block_until_ready(fwd(x, params))

    expected_channels = in_channels + num_convs * out_channels
    assert out.shape == (2, expected_channels, 16, 16), out.shape

    ref = jax.block_until_ready(_dense_block_ref(x, params))
    err = float(jnp.max(jnp.abs(out - ref)))
    assert jnp.allclose(out, ref, atol=1e-4, rtol=1e-4), err

    print("KERNEL_OK")
</pallas_src>

<mosaic_0001>
module attributes {stable_mosaic.version = 11 : i64} {
  func.func @kernel(%arg0: i32, %arg1: i32, %arg2: memref<1x1x8x324xf32, #tpu.memory_space<vmem>>, %arg3: memref<1x1x324xf32, #tpu.memory_space<vmem>>, %arg4: memref<8x1xf32, #tpu.memory_space<vmem>>, %arg5: memref<8x1xf32, #tpu.memory_space<vmem>>, %arg6: memref<72x8xf32, #tpu.memory_space<vmem>>, %arg7: memref<8x1xf32, #tpu.memory_space<vmem>>, %arg8: memref<1x1x8x288xf32, #tpu.memory_space<vmem>>, %arg9: memref<8x384xf32, #tpu.memory_space<vmem>>) attributes {dimension_semantics = [#tpu.dimension_semantics<parallel>, #tpu.dimension_semantics<parallel>], iteration_bounds = array<i64: 2, 1>, scalar_prefetch = 0 : i64, scratch_operands = 1 : i64, tpu.core_type = #tpu.core_type<tc>, window_params = [{transform_indices = @transform_0, window_bounds = array<i64: 1, 1, 8, 324>}, {transform_indices = @transform_1, window_bounds = array<i64: 1, 1, 324>}, {pipeline_mode = #tpu.pipeline_mode<synchronous>, transform_indices = @transform_2, window_bounds = array<i64: 8, 1>}, {pipeline_mode = #tpu.pipeline_mode<synchronous>, transform_indices = @transform_3, window_bounds = array<i64: 8, 1>}, {pipeline_mode = #tpu.pipeline_mode<synchronous>, transform_indices = @transform_4, window_bounds = array<i64: 72, 8>}, {pipeline_mode = #tpu.pipeline_mode<synchronous>, transform_indices = @transform_5, window_bounds = array<i64: 8, 1>}, {transform_indices = @transform_6, window_bounds = array<i64: 1, 1, 8, 288>}]} {
    %cst = arith.constant 0.000000e+00 : f32
    %0 = vector.broadcast %cst : f32 to vector<8x60xf32>
    %c0 = arith.constant 0 : index
    %c324 = arith.constant 324 : index
    %1 = vector.load %arg9[%c0, %c324] : memref<8x384xf32, #tpu.memory_space<vmem>>, vector<8x60xf32>
    tpu.vector_store %arg9[%c0, %c324], %0 {strides = array<i32>} : memref<8x384xf32, #tpu.memory_space<vmem>>, vector<8x60xf32>,
    %c0_0 = arith.constant 0 : index
    %c0_1 = arith.constant 0 : index
    %c0_2 = arith.constant 0 : index
    %2 = vector.load %arg3[%c0_0, %c0_1, %c0_2] : memref<1x1x324xf32, #tpu.memory_space<vmem>>, vector<1x1x324xf32>
    %3 = vector.shape_cast %2 : vector<1x1x324xf32> to vector<1x324xf32>
    %c0_3 = arith.constant 0 : index
    %c0_4 = arith.constant 0 : index
    %c0_5 = arith.constant 0 : index
    %c0_6 = arith.constant 0 : index
    %4 = vector.load %arg2[%c0_3, %c0_4, %c0_5, %c0_6] : memref<1x1x8x324xf32, #tpu.memory_space<vmem>>, vector<1x1x8x324xf32>
    %5 = vector.shape_cast %4 : vector<1x1x8x324xf32> to vector<8x324xf32>
    %c0_7 = arith.constant 0 : index
    %c0_8 = arith.constant 0 : index
    %6 = vector.load %arg4[%c0_7, %c0_8] : memref<8x1xf32, #tpu.memory_space<vmem>>, vector<8x1xf32>
    %c0_9 = arith.constant 0 : index
    %c0_10 = arith.constant 0 : index
    %7 = vector.load %arg5[%c0_9, %c0_10] : memref<8x1xf32, #tpu.memory_space<vmem>>, vector<8x1xf32>
    %8 = vector.broadcast %6 : vector<8x1xf32> to vector<8x324xf32>
    %9 = arith.mulf %5, %8 : vector<8x324xf32>
    %10 = vector.broadcast %7 : vector<8x1xf32> to vector<8x324xf32>
    %11 = arith.addf %9, %10 : vector<8x324xf32>
    %cst_11 = arith.constant 0.000000e+00 : f32
    %12 = vector.broadcast %cst_11 : f32 to vector<8x324xf32>
    %13 = arith.maximumf %11, %12 : vector<8x324xf32>
    %14 = vector.broadcast %3 : vector<1x324xf32> to vector<8x324xf32>
    %15 = arith.mulf %13, %14 : vector<8x324xf32>
    %c0_12 = arith.constant 0 : index
    %c0_13 = arith.constant 0 : index
    %16 = vector.load %arg9[%c0_12, %c0_13] : memref<8x384xf32, #tpu.memory_space<vmem>>, vector<8x324xf32>
    tpu.vector_store %arg9[%c0_12, %c0_13], %15 {strides = array<i32>} : memref<8x384xf32, #tpu.memory_space<vmem>>, vector<8x324xf32>,
    %cst_14 = arith.constant 0.000000e+00 : f32
    %17 = vector.broadcast %cst_14 : f32 to vector<8x288xf32>
    %c0_15 = arith.constant 0 : index
    %c0_16 = arith.constant 0 : index
    %18 = vector.load %arg6[%c0_15, %c0_16] : memref<72x8xf32, #tpu.memory_space<vmem>>, vector<8x8xf32>
    %c0_17 = arith.constant 0 : index
    %c0_18 = arith.constant 0 : index
    %19 = vector.load %arg9[%c0_17, %c0_18] : memref<8x384xf32, #tpu.memory_space<vmem>>, vector<8x288xf32>
    %cst_19 = arith.constant dense<0.000000e+00> : vector<8x288xf32>
    %20 = tpu.matmul %18, %19, %cst_19 {dimension_numbers = #tpu.dot_dimension_numbers<[1], [0], [0], [1], [0, 0, 1, 1], [], []>} : vector<8x8xf32>, vector<8x288xf32>, vector<8x288xf32> -> vector<8x288xf32>
    %21 = arith.addf %17, %20 : vector<8x288xf32>
    %c8 = arith.constant 8 : index
    %c0_20 = arith.constant 0 : index
    %22 = vector.load %arg6[%c8, %c0_20] : memref<72x8xf32, #tpu.memory_space<vmem>>, vector<8x8xf32>
    %c0_21 = arith.constant 0 : index
    %c1 = arith.constant 1 : index
    %23 = vector.load %arg9[%c0_21, %c1] : memref<8x384xf32, #tpu.memory_space<vmem>>, vector<8x288xf32>
    %cst_22 = arith.constant dense<0.000000e+00> : vector<8x288xf32>
    %24 = tpu.matmul %22, %23, %cst_22 {dimension_numbers = #tpu.dot_dimension_numbers<[1], [0], [0], [1], [0, 0, 1, 1], [], []>} : vector<8x8xf32>, vector<8x288xf32>, vector<8x288xf32> -> vector<8x288xf32>
    %25 = arith.addf %21, %24 : vector<8x288xf32>
    %c16 = arith.constant 16 : index
    %c0_23 = arith.constant 0 : index
    %26 = vector.load %arg6[%c16, %c0_23] : memref<72x8xf32, #tpu.memory_space<vmem>>, vector<8x8xf32>
    %c0_24 = arith.constant 0 : index
    %c2 = arith.constant 2 : index
    %27 = vector.load %arg9[%c0_24, %c2] : memref<8x384xf32, #tpu.memory_space<vmem>>, vector<8x288xf32>
    %cst_25 = arith.constant dense<0.000000e+00> : vector<8x288xf32>
    %28 = tpu.matmul %26, %27, %cst_25 {dimension_numbers = #tpu.dot_dimension_numbers<[1], [0], [0], [1], [0, 0, 1, 1], [], []>} : vector<8x8xf32>, vector<8x288xf32>, vector<8x288xf32> -> vector<8x288xf32>
    %29 = arith.addf %25, %28 : vector<8x288xf32>
    %c24 = arith.constant 24 : index
    %c0_26 = arith.constant 0 : index
    %30 = vector.load %arg6[%c24, %c0_26] : memref<72x8xf32, #tpu.memory_space<vmem>>, vector<8x8xf32>
    %c0_27 = arith.constant 0 : index
    %c18 = arith.constant 18 : index
    %31 = vector.load %arg9[%c0_27, %c18] : memref<8x384xf32, #tpu.memory_space<vmem>>, vector<8x288xf32>
    %cst_28 = arith.constant dense<0.000000e+00> : vector<8x288xf32>
    %32 = tpu.matmul %30, %31, %cst_28 {dimension_numbers = #tpu.dot_dimension_numbers<[1], [0], [0], [1], [0, 0, 1, 1], [], []>} : vector<8x8xf32>, vector<8x288xf32>, vector<8x288xf32> -> vector<8x288xf32>
    %33 = arith.addf %29, %32 : vector<8x288xf32>
    %c32 = arith.constant 32 : index
    %c0_29 = arith.constant 0 : index
    %34 = vector.load %arg6[%c32, %c0_29] : memref<72x8xf32, #tpu.memory_space<vmem>>, vector<8x8xf32>
    %c0_30 = arith.constant 0 : index
    %c19 = arith.constant 19 : index
    %35 = vector.load %arg9[%c0_30, %c19] : memref<8x384xf32, #tpu.memory_space<vmem>>, vector<8x288xf32>
    %cst_31 = arith.constant dense<0.000000e+00> : vector<8x288xf32>
    %36 = tpu.matmul %34, %35, %cst_31 {dimension_numbers = #tpu.dot_dimension_numbers<[1], [0], [0], [1], [0, 0, 1, 1], [], []>} : vector<8x8xf32>, vector<8x288xf32>, vector<8x288xf32> -> vector<8x288xf32>
    %37 = arith.addf %33, %36 : vector<8x288xf32>
    %c40 = arith.constant 40 : index
    %c0_32 = arith.constant 0 : index
    %38 = vector.load %arg6[%c40, %c0_32] : memref<72x8xf32, #tpu.memory_space<vmem>>, vector<8x8xf32>
    %c0_33 = arith.constant 0 : index
    %c20 = arith.constant 20 : index
    %39 = vector.load %arg9[%c0_33, %c20] : memref<8x384xf32, #tpu.memory_space<vmem>>, vector<8x288xf32>
    %cst_34 = arith.constant dense<0.000000e+00> : vector<8x288xf32>
    %40 = tpu.matmul %38, %39, %cst_34 {dimension_numbers = #tpu.dot_dimension_numbers<[1], [0], [0], [1], [0, 0, 1, 1], [], []>} : vector<8x8xf32>, vector<8x288xf32>, vector<8x288xf32> -> vector<8x288xf32>
    %41 = arith.addf %37, %40 : vector<8x288xf32>
    %c48 = arith.constant 48 : index
    %c0_35 = arith.constant 0 : index
    %42 = vector.load %arg6[%c48, %c0_35] : memref<72x8xf32, #tpu.memory_space<vmem>>, vector<8x8xf32>
    %c0_36 = arith.constant 0 : index
    %c36 = arith.constant 36 : index
    %43 = vector.load %arg9[%c0_36, %c36] : memref<8x384xf32, #tpu.memory_space<vmem>>, vector<8x288xf32>
    %cst_37 = arith.constant dense<0.000000e+00> : vector<8x288xf32>
    %44 = tpu.matmul %42, %43, %cst_37 {dimension_numbers = #tpu.dot_dimension_numbers<[1], [0], [0], [1], [0, 0, 1, 1], [], []>} : vector<8x8xf32>, vector<8x288xf32>, vector<8x288xf32> -> vector<8x288xf32>
    %45 = arith.addf %41, %44 : vector<8x288xf32>
    %c56 = arith.constant 56 : index
    %c0_38 = arith.constant 0 : index
    %46 = vector.load %arg6[%c56, %c0_38] : memref<72x8xf32, #tpu.memory_space<vmem>>, vector<8x8xf32>
    %c0_39 = arith.constant 0 : index
    %c37 = arith.constant 37 : index
    %47 = vector.load %arg9[%c0_39, %c37] : memref<8x384xf32, #tpu.memory_space<vmem>>, vector<8x288xf32>
    %cst_40 = arith.constant dense<0.000000e+00> : vector<8x288xf32>
    %48 = tpu.matmul %46, %47, %cst_40 {dimension_numbers = #tpu.dot_dimension_numbers<[1], [0], [0], [1], [0, 0, 1, 1], [], []>} : vector<8x8xf32>, vector<8x288xf32>, vector<8x288xf32> -> vector<8x288xf32>
    %49 = arith.addf %45, %48 : vector<8x288xf32>
    %c64 = arith.constant 64 : index
    %c0_41 = arith.constant 0 : index
    %50 = vector.load %arg6[%c64, %c0_41] : memref<72x8xf32, #tpu.memory_space<vmem>>, vector<8x8xf32>
    %c0_42 = arith.constant 0 : index
    %c38 = arith.constant 38 : index
    %51 = vector.load %arg9[%c0_42, %c38] : memref<8x384xf32, #tpu.memory_space<vmem>>, vector<8x288xf32>
    %cst_43 = arith.constant dense<0.000000e+00> : vector<8x288xf32>
    %52 = tpu.matmul %50, %51, %cst_43 {dimension_numbers = #tpu.dot_dimension_numbers<[1], [0], [0], [1], [0, 0, 1, 1], [], []>} : vector<8x8xf32>, vector<8x288xf32>, vector<8x288xf32> -> vector<8x288xf32>
    %53 = arith.addf %49, %52 : vector<8x288xf32>
    %c0_44 = arith.constant 0 : index
    %c0_45 = arith.constant 0 : index
    %54 = vector.load %arg7[%c0_44, %c0_45] : memref<8x1xf32, #tpu.memory_space<vmem>>, vector<8x1xf32>
    %55 = vector.broadcast %54 : vector<8x1xf32> to vector<8x288xf32>
    %56 = arith.addf %53, %55 : vector<8x288xf32>
    %57 = vector.shape_cast %56 : vector<8x288xf32> to vector<1x1x8x288xf32>
    %c0_46 = arith.constant 0 : index
    %c0_47 = arith.constant 0 : index
    %c0_48 = arith.constant 0 : index
    %c0_49 = arith.constant 0 : index
    %58 = vector.load %arg8[%c0_46, %c0_47, %c0_48, %c0_49] : memref<1x1x8x288xf32, #tpu.memory_space<vmem>>, vector<1x1x8x288xf32>
    tpu.vector_store %arg8[%c0_46, %c0_47, %c0_48, %c0_49], %57 {strides = array<i32>} : memref<1x1x8x288xf32, #tpu.memory_space<vmem>>, vector<1x1x8x288xf32>,
    return
  }
  func.func @transform_0(%arg0: i32, %arg1: i32) -> (i32, i32, i32, i32) {
    %c0_i32 = arith.constant 0 : i32
    %c0_i32_0 = arith.constant 0 : i32
    %c0_i32_1 = arith.constant 0 : i32
    return %arg0, %arg1, %c0_i32, %c0_i32_0 : i32, i32, i32, i32
  }
  func.func @transform_1(%arg0: i32, %arg1: i32) -> (i32, i32, i32) {
    %c0_i32 = arith.constant 0 : i32
    %c0_i32_0 = arith.constant 0 : i32
    %c0_i32_1 = arith.constant 0 : i32
    return %arg1, %c0_i32, %c0_i32_0 : i32, i32, i32
  }
  func.func @transform_2(%arg0: i32, %arg1: i32) -> (i32, i32) {
    %c0_i32 = arith.constant 0 : i32
    %c0_i32_0 = arith.constant 0 : i32
    %c0_i32_1 = arith.constant 0 : i32
    return %c0_i32, %c0_i32_0 : i32, i32
  }
  func.func @transform_3(%arg0: i32, %arg1: i32) -> (i32, i32) {
    %c0_i32 = arith.constant 0 : i32
    %c0_i32_0 = arith.constant 0 : i32
    %c0_i32_1 = arith.constant 0 : i32
    return %c0_i32, %c0_i32_0 : i32, i32
  }
  func.func @transform_4(%arg0: i32, %arg1: i32) -> (i32, i32) {
    %c0_i32 = arith.constant 0 : i32
    %c0_i32_0 = arith.constant 0 : i32
    %c0_i32_1 = arith.constant 0 : i32
    return %c0_i32, %c0_i32_0 : i32, i32
  }
  func.func @transform_5(%arg0: i32, %arg1: i32) -> (i32, i32) {
    %c0_i32 = arith.constant 0 : i32
    %c0_i32_0 = arith.constant 0 : i32
    %c0_i32_1 = arith.constant 0 : i32
    return %c0_i32, %c0_i32_0 : i32, i32
  }
  func.func @transform_6(%arg0: i32, %arg1: i32) -> (i32, i32, i32, i32) {
    %c0_i32 = arith.constant 0 : i32
    %c0_i32_0 = arith.constant 0 : i32
    %c0_i32_1 = arith.constant 0 : i32
    return %arg0, %arg1, %c0_i32, %c0_i32_0 : i32, i32, i32, i32
  }
}

module attributes {stable_mosaic.version = 11 : i64} {
  func.func @kernel(%arg0: i32, %arg1: i32, %arg2: memref<1x1x8x324xf32, #tpu.memory_space<vmem>>, %arg3: memref<1x1x8x324xf32, #tpu.memory_space<vmem>>, %arg4: memref<1x1x324xf32, #tpu.memory_space<vmem>>, %arg5: memref<8x1xf32, #tpu.memory_space<vmem>>, %arg6: memref<8x1xf32, #tpu.memory_space<vmem>>, %arg7: memref<8x1xf32, #tpu.memory_space<vmem>>, %arg8: memref<8x1xf32, #tpu.memory_space<vmem>>, %arg9: memref<72x16xf32, #tpu.memory_space<vmem>>, %arg10: memref<8x1xf32, #tpu.memory_space<vmem>>, %arg11: memref<1x1x8x288xf32, #tpu.memory_space<vmem>>, %arg12: memref<16x384xf32, #tpu.memory_space<vmem>>) attributes {dimension_semantics = [#tpu.dimension_semantics<parallel>, #tpu.dimension_semantics<parallel>], iteration_bounds = array<i64: 2, 1>, scalar_prefetch = 0 : i64, scratch_operands = 1 : i64, tpu.core_type = #tpu.core_type<tc>, window_params = [{transform_indices = @transform_0, window_bounds = array<i64: 1, 1, 8, 324>}, {transform_indices = @transform_1, window_bounds = array<i64: 1, 1, 8, 324>}, {transform_indices = @transform_2, window_bounds = array<i64: 1, 1, 324>}, {pipeline_mode = #tpu.pipeline_mode<synchronous>, transform_indices = @transform_3, window_bounds = array<i64: 8, 1>}, {pipeline_mode = #tpu.pipeline_mode<synchronous>, transform_indices = @transform_4, window_bounds = array<i64: 8, 1>}, {pipeline_mode = #tpu.pipeline_mode<synchronous>, transform_indices = @transform_5, window_bounds = array<i64: 8, 1>}, {pipeline_mode = #tpu.pipeline_mode<synchronous>, transform_indices = @transform_6, window_bounds = array<i64: 8, 1>}, {pipeline_mode = #tpu.pipeline_mode<synchronous>, transform_indices = @transform_7, window_bounds = array<i64: 72, 16>}, {pipeline_mode = #tpu.pipeline_mode<synchronous>, transform_indices = @transform_8, window_bounds = array<i64: 8, 1>}, {transform_indices = @transform_9, window_bounds = array<i64: 1, 1, 8, 288>}]} {
    %cst = arith.constant 0.000000e+00 : f32
    %0 = vector.broadcast %cst : f32 to vector<16x60xf32>
    %c0 = arith.constant 0 : index
    %c324 = arith.constant 324 : index
    %1 = vector.load %arg12[%c0, %c324] : memref<16x384xf32, #tpu.memory_space<vmem>>, vector<16x60xf32>
    tpu.vector_store %arg12[%c0, %c324], %0 {strides = array<i32>} : memref<16x384xf32, #tpu.memory_space<vmem>>, vector<16x60xf32>,
    %c0_0 = arith.constant 0 : index
    %c0_1 = arith.constant 0 : index
    %c0_2 = arith.constant 0 : index
    %2 = vector.load %arg4[%c0_0, %c0_1, %c0_2] : memref<1x1x324xf32, #tpu.memory_space<vmem>>, vector<1x1x324xf32>
    %3 = vector.shape_cast %2 : vector<1x1x324xf32> to vector<1x324xf32>
    %c0_3 = arith.constant 0 : index
    %c0_4 = arith.constant 0 : index
    %c0_5 = arith.constant 0 : index
    %c0_6 = arith.constant 0 : index
    %4 = vector.load %arg2[%c0_3, %c0_4, %c0_5, %c0_6] : memref<1x1x8x324xf32, #tpu.memory_space<vmem>>, vector<1x1x8x324xf32>
    %5 = vector.shape_cast %4 : vector<1x1x8x324xf32> to vector<8x324xf32>
    %c0_7 = arith.constant 0 : index
    %c0_8 = arith.constant 0 : index
    %6 = vector.load %arg5[%c0_7, %c0_8] : memref<8x1xf32, #tpu.memory_space<vmem>>, vector<8x1xf32>
    %c0_9 = arith.constant 0 : index
    %c0_10 = arith.constant 0 : index
    %7 = vector.load %arg6[%c0_9, %c0_10] : memref<8x1xf32, #tpu.memory_space<vmem>>, vector<8x1xf32>
    %8 = vector.broadcast %6 : vector<8x1xf32> to vector<8x324xf32>
    %9 = arith.mulf %5, %8 : vector<8x324xf32>
    %10 = vector.broadcast %7 : vector<8x1xf32> to vector<8x324xf32>
    %11 = arith.addf %9, %10 : vector<8x324xf32>
    %cst_11 = arith.constant 0.000000e+00 : f32
    %12 = vector.broadcast %cst_11 : f32 to vector<8x324xf32>
    %13 = arith.maximumf %11, %12 : vector<8x324xf32>
    %14 = vector.broadcast %3 : vector<1x324xf32> to vector<8x324xf32>
    %15 = arith.mulf %13, %14 : vector<8x324xf32>
    %c0_12 = arith.constant 0 : index
    %c0_13 = arith.constant 0 : index
    %16 = vector.load %arg12[%c0_12, %c0_13] : memref<16x384xf32, #tpu.memory_space<vmem>>, vector<8x324xf32>
    tpu.vector_store %arg12[%c0_12, %c0_13], %15 {strides = array<i32>} : memref<16x384xf32, #tpu.memory_space<vmem>>, vector<8x324xf32>,
    %c0_14 = arith.constant 0 : index
    %c0_15 = arith.constant 0 : index
    %c0_16 = arith.constant 0 : index
    %c0_17 = arith.constant 0 : index
    %17 = vector.load %arg3[%c0_14, %c0_15, %c0_16, %c0_17] : memref<1x1x8x324xf32, #tpu.memory_space<vmem>>, vector<1x1x8x324xf32>
    %18 = vector.shape_cast %17 : vector<1x1x8x324xf32> to vector<8x324xf32>
    %c0_18 = arith.constant 0 : index
    %c0_19 = arith.constant 0 : index
    %19 = vector.load %arg7[%c0_18, %c0_19] : memref<8x1xf32, #tpu.memory_space<vmem>>, vector<8x1xf32>
    %c0_20 = arith.constant 0 : index
    %c0_21 = arith.constant 0 : index
    %20 = vector.load %arg8[%c0_20, %c0_21] : memref<8x1xf32, #tpu.memory_space<vmem>>, vector<8x1xf32>
    %21 = vector.broadcast %19 : vector<8x1xf32> to vector<8x324xf32>
    %22 = arith.mulf %18, %21 : vector<8x324xf32>
    %23 = vector.broadcast %20 : vector<8x1xf32> to vector<8x324xf32>
    %24 = arith.addf %22, %23 : vector<8x324xf32>
    %cst_22 = arith.constant 0.000000e+00 : f32
    %25 = vector.broadcast %cst_22 : f32 to vector<8x324xf32>
    %26 = arith.maximumf %24, %25 : vector<8x324xf32>
    %27 = vector.broadcast %3 : vector<1x324xf32> to vector<8x324xf32>
    %28 = arith.mulf %26, %27 : vector<8x324xf32>
    %c8 = arith.constant 8 : index
    %c0_23 = arith.constant 0 : index
    %29 = vector.load %arg12[%c8, %c0_23] : memref<16x384xf32, #tpu.memory_space<vmem>>, vector<8x324xf32>
    tpu.vector_store %arg12[%c8, %c0_23], %28 {strides = array<i32>} : memref<16x384xf32, #tpu.memory_space<vmem>>, vector<8x324xf32>,
    %cst_24 = arith.constant 0.000000e+00 : f32
    %30 = vector.broadcast %cst_24 : f32 to vector<8x288xf32>
    %c0_25 = arith.constant 0 : index
    %c0_26 = arith.constant 0 : index
    %31 = vector.load %arg9[%c0_25, %c0_26] : memref<72x16xf32, #tpu.memory_space<vmem>>, vector<8x16xf32>
    %c0_27 = arith.constant 0 : index
    %c0_28 = arith.constant 0 : index
    %32 = vector.load %arg12[%c0_27, %c0_28] : memref<16x384xf32, #tpu.memory_space<vmem>>, vector<16x288xf32>
    %cst_29 = arith.constant dense<0.000000e+00> : vector<8x288xf32>
    %33 = tpu.matmul %31, %32, %cst_29 {dimension_numbers = #tpu.dot_dimension_numbers<[1], [0], [0], [1], [0, 0, 1, 1], [], []>} : vector<8x16xf32>, vector<16x288xf32>, vector<8x288xf32> -> vector<8x288xf32>
    %34 = arith.addf %30, %33 : vector<8x288xf32>
    %c8_30 = arith.constant 8 : index
    %c0_31 = arith.constant 0 : index
    %35 = vector.load %arg9[%c8_30, %c0_31] : memref<72x16xf32, #tpu.memory_space<vmem>>, vector<8x16xf32>
    %c0_32 = arith.constant 0 : index
    %c1 = arith.constant 1 : index
    %36 = vector.load %arg12[%c0_32, %c1] : memref<16x384xf32, #tpu.memory_space<vmem>>, vector<16x288xf32>
    %cst_33 = arith.constant dense<0.000000e+00> : vector<8x288xf32>
    %37 = tpu.matmul %35, %36, %cst_33 {dimension_numbers = #tpu.dot_dimension_numbers<[1], [0], [0], [1], [0, 0, 1, 1], [], []>} : vector<8x16xf32>, vector<16x288xf32>, vector<8x288xf32> -> vector<8x288xf32>
    %38 = arith.addf %34, %37 : vector<8x288xf32>
    %c16 = arith.constant 16 : index
    %c0_34 = arith.constant 0 : index
    %39 = vector.load %arg9[%c16, %c0_34] : memref<72x16xf32, #tpu.memory_space<vmem>>, vector<8x16xf32>
    %c0_35 = arith.constant 0 : index
    %c2 = arith.constant 2 : index
    %40 = vector.load %arg12[%c0_35, %c2] : memref<16x384xf32, #tpu.memory_space<vmem>>, vector<16x288xf32>
    %cst_36 = arith.constant dense<0.000000e+00> : vector<8x288xf32>
    %41 = tpu.matmul %39, %40, %cst_36 {dimension_numbers = #tpu.dot_dimension_numbers<[1], [0], [0], [1], [0, 0, 1, 1], [], []>} : vector<8x16xf32>, vector<16x288xf32>, vector<8x288xf32> -> vector<8x288xf32>
    %42 = arith.addf %38, %41 : vector<8x288xf32>
    %c24 = arith.constant 24 : index
    %c0_37 = arith.constant 0 : index
    %43 = vector.load %arg9[%c24, %c0_37] : memref<72x16xf32, #tpu.memory_space<vmem>>, vector<8x16xf32>
    %c0_38 = arith.constant 0 : index
    %c18 = arith.constant 18 : index
    %44 = vector.load %arg12[%c0_38, %c18] : memref<16x384xf32, #tpu.memory_space<vmem>>, vector<16x288xf32>
    %cst_39 = arith.constant dense<0.000000e+00> : vector<8x288xf32>
    %45 = tpu.matmul %43, %44, %cst_39 {dimension_numbers = #tpu.dot_dimension_numbers<[1], [0], [0], [1], [0, 0, 1, 1], [], []>} : vector<8x16xf32>, vector<16x288xf32>, vector<8x288xf32> -> vector<8x288xf32>
    %46 = arith.addf %42, %45 : vector<8x288xf32>
    %c32 = arith.constant 32 : index
    %c0_40 = arith.constant 0 : index
    %47 = vector.load %arg9[%c32, %c0_40] : memref<72x16xf32, #tpu.memory_space<vmem>>, vector<8x16xf32>
    %c0_41 = arith.constant 0 : index
    %c19 = arith.constant 19 : index
    %48 = vector.load %arg12[%c0_41, %c19] : memref<16x384xf32, #tpu.memory_space<vmem>>, vector<16x288xf32>
    %cst_42 = arith.constant dense<0.000000e+00> : vector<8x288xf32>
    %49 = tpu.matmul %47, %48, %cst_42 {dimension_numbers = #tpu.dot_dimension_numbers<[1], [0], [0], [1], [0, 0, 1, 1], [], []>} : vector<8x16xf32>, vector<16x288xf32>, vector<8x288xf32> -> vector<8x288xf32>
    %50 = arith.addf %46, %49 : vector<8x288xf32>
    %c40 = arith.constant 40 : index
    %c0_43 = arith.constant 0 : index
    %51 = vector.load %arg9[%c40, %c0_43] : memref<72x16xf32, #tpu.memory_space<vmem>>, vector<8x16xf32>
    %c0_44 = arith.constant 0 : index
    %c20 = arith.constant 20 : index
    %52 = vector.load %arg12[%c0_44, %c20] : memref<16x384xf32, #tpu.memory_space<vmem>>, vector<16x288xf32>
    %cst_45 = arith.constant dense<0.000000e+00> : vector<8x288xf32>
    %53 = tpu.matmul %51, %52, %cst_45 {dimension_numbers = #tpu.dot_dimension_numbers<[1], [0], [0], [1], [0, 0, 1, 1], [], []>} : vector<8x16xf32>, vector<16x288xf32>, vector<8x288xf32> -> vector<8x288xf32>
    %54 = arith.addf %50, %53 : vector<8x288xf32>
    %c48 = arith.constant 48 : index
    %c0_46 = arith.constant 0 : index
    %55 = vector.load %arg9[%c48, %c0_46] : memref<72x16xf32, #tpu.memory_space<vmem>>, vector<8x16xf32>
    %c0_47 = arith.constant 0 : index
    %c36 = arith.constant 36 : index
    %56 = vector.load %arg12[%c0_47, %c36] : memref<16x384xf32, #tpu.memory_space<vmem>>, vector<16x288xf32>
    %cst_48 = arith.constant dense<0.000000e+00> : vector<8x288xf32>
    %57 = tpu.matmul %55, %56, %cst_48 {dimension_numbers = #tpu.dot_dimension_numbers<[1], [0], [0], [1], [0, 0, 1, 1], [], []>} : vector<8x16xf32>, vector<16x288xf32>, vector<8x288xf32> -> vector<8x288xf32>
    %58 = arith.addf %54, %57 : vector<8x288xf32>
    %c56 = arith.constant 56 : index
    %c0_49 = arith.constant 0 : index
    %59 = vector.load %arg9[%c56, %c0_49] : memref<72x16xf32, #tpu.memory_space<vmem>>, vector<8x16xf32>
    %c0_50 = arith.constant 0 : index
    %c37 = arith.constant 37 : index
    %60 = vector.load %arg12[%c0_50, %c37] : memref<16x384xf32, #tpu.memory_space<vmem>>, vector<16x288xf32>
    %cst_51 = arith.constant dense<0.000000e+00> : vector<8x288xf32>
    %61 = tpu.matmul %59, %60, %cst_51 {dimension_numbers = #tpu.dot_dimension_numbers<[1], [0], [0], [1], [0, 0, 1, 1], [], []>} : vector<8x16xf32>, vector<16x288xf32>, vector<8x288xf32> -> vector<8x288xf32>
    %62 = arith.addf %58, %61 : vector<8x288xf32>
    %c64 = arith.constant 64 : index
    %c0_52 = arith.constant 0 : index
    %63 = vector.load %arg9[%c64, %c0_52] : memref<72x16xf32, #tpu.memory_space<vmem>>, vector<8x16xf32>
    %c0_53 = arith.constant 0 : index
    %c38 = arith.constant 38 : index
    %64 = vector.load %arg12[%c0_53, %c38] : memref<16x384xf32, #tpu.memory_space<vmem>>, vector<16x288xf32>
    %cst_54 = arith.constant dense<0.000000e+00> : vector<8x288xf32>
    %65 = tpu.matmul %63, %64, %cst_54 {dimension_numbers = #tpu.dot_dimension_numbers<[1], [0], [0], [1], [0, 0, 1, 1], [], []>} : vector<8x16xf32>, vector<16x288xf32>, vector<8x288xf32> -> vector<8x288xf32>
    %66 = arith.addf %62, %65 : vector<8x288xf32>
    %c0_55 = arith.constant 0 : index
    %c0_56 = arith.constant 0 : index
    %67 = vector.load %arg10[%c0_55, %c0_56] : memref<8x1xf32, #tpu.memory_space<vmem>>, vector<8x1xf32>
    %68 = vector.broadcast %67 : vector<8x1xf32> to vector<8x288xf32>
    %69 = arith.addf %66, %68 : vector<8x288xf32>
    %70 = vector.shape_cast %69 : vector<8x288xf32> to vector<1x1x8x288xf32>
    %c0_57 = arith.constant 0 : index
    %c0_58 = arith.constant 0 : index
    %c0_59 = arith.constant 0 : index
    %c0_60 = arith.constant 0 : index
    %71 = vector.load %arg11[%c0_57, %c0_58, %c0_59, %c0_60] : memref<1x1x8x288xf32, #tpu.memory_space<vmem>>, vector<1x1x8x288xf32>
    tpu.vector_store %arg11[%c0_57, %c0_58, %c0_59, %c0_60], %70 {strides = array<i32>} : memref<1x1x8x288xf32, #tpu.memory_space<vmem>>, vector<1x1x8x288xf32>,
    return
  }
  func.func @transform_0(%arg0: i32, %arg1: i32) -> (i32, i32, i32, i32) {
    %c0_i32 = arith.constant 0 : i32
    %c0_i32_0 = arith.constant 0 : i32
    %c0_i32_1 = arith.constant 0 : i32
    return %arg0, %arg1, %c0_i32, %c0_i32_0 : i32, i32, i32, i32
  }
  func.func @transform_1(%arg0: i32, %arg1: i32) -> (i32, i32, i32, i32) {
    %c0_i32 = arith.constant 0 : i32
    %c0_i32_0 = arith.constant 0 : i32
    %c0_i32_1 = arith.constant 0 : i32
    return %arg0, %arg1, %c0_i32, %c0_i32_0 : i32, i32, i32, i32
  }
  func.func @transform_2(%arg0: i32, %arg1: i32) -> (i32, i32, i32) {
    %c0_i32 = arith.constant 0 : i32
    %c0_i32_0 = arith.constant 0 : i32
    %c0_i32_1 = arith.constant 0 : i32
    return %arg1, %c0_i32, %c0_i32_0 : i32, i32, i32
  }
  func.func @transform_3(%arg0: i32, %arg1: i32) -> (i32, i32) {
    %c0_i32 = arith.constant 0 : i32
    %c0_i32_0 = arith.constant 0 : i32
    %c0_i32_1 = arith.constant 0 : i32
    return %c0_i32, %c0_i32_0 : i32, i32
  }
  func.func @transform_4(%arg0: i32, %arg1: i32) -> (i32, i32) {
    %c0_i32 = arith.constant 0 : i32
    %c0_i32_0 = arith.constant 0 : i32
    %c0_i32_1 = arith.constant 0 : i32
    return %c0_i32, %c0_i32_0 : i32, i32
  }
  func.func @transform_5(%arg0: i32, %arg1: i32) -> (i32, i32) {
    %c0_i32 = arith.constant 0 : i32
    %c0_i32_0 = arith.constant 0 : i32
    %c0_i32_1 = arith.constant 0 : i32
    return %c0_i32, %c0_i32_0 : i32, i32
  }
  func.func @transform_6(%arg0: i32, %arg1: i32) -> (i32, i32) {
    %c0_i32 = arith.constant 0 : i32
    %c0_i32_0 = arith.constant 0 : i32
    %c0_i32_1 = arith.constant 0 : i32
    return %c0_i32, %c0_i32_0 : i32, i32
  }
  func.func @transform_7(%arg0: i32, %arg1: i32) -> (i32, i32) {
    %c0_i32 = arith.constant 0 : i32
    %c0_i32_0 = arith.constant 0 : i32
    %c0_i32_1 = arith.constant 0 : i32
    return %c0_i32, %c0_i32_0 : i32, i32
  }
  func.func @transform_8(%arg0: i32, %arg1: i32) -> (i32, i32) {
    %c0_i32 = arith.constant 0 : i32
    %c0_i32_0 = arith.constant 0 : i32
    %c0_i32_1 = arith.constant 0 : i32
    return %c0_i32, %c0_i32_0 : i32, i32
  }
  func.func @transform_9(%arg0: i32, %arg1: i32) -> (i32, i32, i32, i32) {
    %c0_i32 = arith.constant 0 : i32
    %c0_i32_0 = arith.constant 0 : i32
    %c0_i32_1 = arith.constant 0 : i32
    return %arg0, %arg1, %c0_i32, %c0_i32_0 : i32, i32, i32, i32
  }
}

</mosaic_0001>

<bundles_post_ra>
// kernel: dense_block_forward.2
= control target key start
LH: loop header
LB: loop body
LE: loop exit
PB: predicated region body
PF: predicated region fallthrough
CT: control target
= control target key end

     0   :  { %s1349_s21 = smov 0   ;;  %s1351_s22 = smov 0   ;;  %s1484_s0 = inlined_call_operand.vmem [shape: f32[2,1,8,324], index: 0, kind: input, shape index: {}]   ;;  %s1485_s1 = inlined_call_operand.vmem [shape: f32[1,1,324], index: 1, kind: input, shape index: {}]   ;;  %s1486_s2 = inlined_call_operand.vmem [shape: f32[8,1], index: 2, kind: input, shape index: {}]   ;;  %s1487_s3 = inlined_call_operand.vmem [shape: f32[8,1], index: 3, kind: input, shape index: {}]   ;;  %s1488_s4 = inlined_call_operand.vmem [shape: f32[72,8], index: 4, kind: input, shape index: {}]   ;;  %s1489_s5 = inlined_call_operand.vmem [shape: f32[8,1], index: 5, kind: input, shape index: {}]   ;;  %s1490_s6 = inlined_call_operand.vmem [shape: f32[2,1,8,288], index: 6, kind: output, shape index: {}]  }
   0x1   :  { %s1353_s23 = smov 0  }
   0x2 LB: > { %s28_s24 = sadd.s32 1, %s1298_s22  ;;  %p1172_p0 = scmp.ge.s32.totalorder %s1302_s23, 1  ;;  %s1302_s23 = sphi %s1353_s23, %s16_s23   ;;  %s1298_s22 = sphi %s1351_s22, %s1492_s22   ;;  %s1294_s21 = sphi %s1349_s21, %s1491_s21  }
   0x3   : > { %p30_p1 = scmp.ge.s32.totalorder %s28_s24, 2  ;;  %p241_p2 = scmp.lt.s32.totalorder %s1302_s23, 3 }
   0x5   : > { %s1494_s24 = smov (%p30_p1, %s28_s24), 0  ;;  %p242_p3 = pnand %p1172_p0, %p241_p2 }
   0x6   : > { %p283_p4 = scmp.lt.s32.totalorder (!%p242_p3), %s1294_s21, 1  ;;  %s1306_s11 = smov (!%p242_p3), 126  }
   0x7   : > { %245 = sbr.rel (%p242_p3) target bundleno = 460 (0x1cc), region = 44  ;;  %s1307_s12 = smov (!%p242_p3), 110  }
   0x8   : > { %s1308_s13 = smov (!%p242_p3), 127   ;;  %s1309_s14 = smov (!%p242_p3), 109  }
   0x9   : > { %s1310_s15 = smov (!%p242_p3), 92   ;;  %s1311_s16 = smov (!%p242_p3), 108  }
   0xa   : > { %s1312_s17 = smov (!%p242_p3), 91   ;;  %s1313_s20 = smov (!%p242_p3), 90  }
   0xc   : > { %v311_v0 = vld [vmem:[%s1486_s2] sm:$0xff]  ;;  %v1304_v1 = vmov 0   ;;  %vm305_vm0 = vcmask 1048096   ;;  %v1305_v3 = vmov 0.0   ;;  %s1496_s21 = smov (!%p283_p4, %s1294_s21), 1  ;;  %vm344_vm1 = vcmask 556032  }
   0xd   : > { %1239 = vset.pattern.permute.xlu0 %v1304_v1  ;;  %v312_v2 = vld [vmem:[%s1487_s3] sm:$0xff]  ;;  %306 = vst.msk [vmem:[#allocation2 + $0x10] sm:$0xff] %vm305_vm0, %v1305_v3  ;;  %s1204_s29 = smul.u32 24, %s1496_s21  ;;  %vm366_vm2 = vcmask 64512   ;;  %vm500_vm3 = vcmask 1031168   ;;  %v1409_v35 = vld [vmem:[%s1488_s4 + $0x10] sm:$0xff] }
   0xe   : > { %315 = vperm.xlu0 %1239, %v311_v0   ;;  %v307_v8 = vld [vmem:[%s1485_s1] sm:$0x7]  ;;  %vm579_vm4 = vcmask 900096   ;;  %v350_v42 = vld [vmem:[%s1488_s4 + $0x8] sm:$0xff]  ;;  %v572_v45 = vld [vmem:[%s1488_s4 + $0x18] sm:$0xff]  ;;  %vm360_vm5 = vcmask 1039360  }
   0xf   : > { %s291_s8 = scalar_lea.vmem %s1484_s0, %s1204_s29  ;;  %v333_v13 = vperm.slane %v307_v8, 0  ;;  %v334_v14 = vperm.slane %v307_v8, 1  ;;  %v335_v18 = vperm.slane %v307_v8, 2  ;;  %v1046_v29 = vld [vmem:[%s1489_s5] sm:$0xff]  ;;  %vm658_vm6 = vcmask 891904   ;;  %v730_v8 = vld [vmem:[%s1488_s4 + $0x28] sm:$0xff]  ;;  %s304_s26 = scalar_lea.vmem %s1490_s6, %s1204_s29 }
  0x10   : > { %v308_v5 = vld [vmem:[%s291_s8] sm:$0xff]  ;;  %v309_v6 = vld [vmem:[%s291_s8 + $0x8] sm:$0xff]  ;;  %v310_v7 = vld [vmem:[%s291_s8 + $0x10] sm:$0xff]  ;;  %vm816_vm7 = vcmask 752640   ;;  %vm737_vm8 = vcmask 883712   ;;  %vm895_vm9 = vcmask 744448  }
  0x11   : > { %v346_v31 = vld [vmem:[%s1488_s4] sm:$0xff]  ;;  %vm974_vm10 = vcmask 736256   ;;  %vm1057_vm11 = vcmask 261120  }
  0x16   : > { %323 = vperm.xlu0 %1239, %v312_v2  }
  0x80   : > { %v316_v4 = vpop.permute.xlu0 %315 }
  0x81   : > { %v318_v9 = vmul.f32 %v316_v4, %v308_v5  ;;  %v319_v10 = vmul.f32 %v316_v4, %v309_v6  ;;  %v320_v11 = vmul.f32 %v316_v4, %v310_v7  ;;  %v651_v5 = vld [vmem:[%s1488_s4 + $0x20] sm:$0xff] }
  0x88   : > { %v324_v12 = vpop.permute.xlu0 %323 }
  0x89   : > { %v326_v15 = vadd.f32 %v324_v12, %v318_v9  ;;  %v327_v16 = vadd.f32 %v324_v12, %v319_v10  ;;  %v328_v17 = vadd.f32 %v324_v12, %v320_v11 }
  0x8b   : > { %v329_v19 = vmax.f32 %v326_v15, 0.0  ;;  %v330_v20 = vmax.f32 %v327_v16, 0.0  ;;  %v331_v21 = vmax.f32 %v328_v17, 0.0 }
  0x8d   : > { %v339_v22 = vmul.f32 %v333_v13, %v329_v19  ;;  %v1384_v23 = vmul.f32 %v334_v14, %v330_v20  ;;  %v341_v24 = vmul.f32 %v335_v18, %v331_v21  ;;  %v809_v13 = vld [vmem:[%s1488_s4 + $0x30] sm:$0xff]  ;;  %v888_v19 = vld [vmem:[%s1488_s4 + $0x38] sm:$0xff] }
  0x8f   : > { %448 = vmatpush.msra.mxu3 %v339_v22  ;;  %v1245_v25 = vpack.i.bf16 %v1384_v23, %v339_v22  ;;  %345 = vst.msk [vmem:[#allocation2 + $0x10] sm:$0xff] %vm344_vm1, %v341_v24 }
  0x90   : > { %1178 = vmatmul.msk.f32.vlgmr.msra.gmra.mxu3 %vm366_vm2, %v346_v31 }
  0x91   : > { %1246 = vrot.lane.b32.xlu2 %v1245_v25, %s1306_s11 }
  0x96   : > { %v1387_v26 = vld [vmem:[#allocation2 + $0x10] sm:$0xff] }
  0x97   : > { %v1250_v27 = vpack.i.bf16 %v1387_v26, %v1384_v23  ;;  %v1240_v28 = vpack.i.bf16 %v339_v22, %v1387_v26 }
  0x99   : > { %498 = vrot.lane.b32.xlu2 %v1387_v26, %s1306_s11  ;;  %1251 = vrot.lane.b32.xlu0 %v1250_v27, %s1307_s12 }
  0x9a   : > { %1241 = vrot.lane.b32.xlu1 %v1240_v28, %s1308_s13 }
  0xa1   : > { %1256 = vrot.lane.b32.xlu2 %v1240_v28, %s1309_s14  ;;  %654 = vrot.lane.b32.xlu0 %v1384_v23, %s1309_s14 }
  0xa2   : > { %356 = vrot.lane.b32.xlu1 %v1384_v23, %s1308_s13 }
  0xa9   : > { %1266 = vrot.lane.b32.xlu2 %v1245_v25, %s1310_s15  ;;  %735 = vrot.lane.b32.xlu0 %v1387_v26, %s1311_s16 }
  0xaa   : > { %573 = vrot.lane.b32.xlu1 %v339_v22, %s1307_s12 }
  0xb1   : > { %1271 = vrot.lane.b32.xlu2 %v1250_v27, %s1312_s17  ;;  %889 = vrot.lane.b32.xlu0 %v339_v22, %s1312_s17  ;;  %v967_v22 = vld [vmem:[%s1488_s4 + $0x40] sm:$0xff] }
  0xb2   : > { %1261 = vrot.lane.b32.xlu1 %v1245_v25, %s1311_s16 }
  0xb9   : > { %970 = vrot.lane.b32.xlu2 %v1384_v23, %s1313_s20  ;;  %1049 = vperm.xlu0 %1239, %v1046_v29  }
  0xba   : > { %814 = vrot.lane.b32.xlu1 %v1387_v26, %s1310_s15 }
  0xc2   : > { %1276 = vrot.lane.b32.xlu1 %v1240_v28, %s1313_s20 }
  0xeb   : > { %v1247_v30 = vpop.permute.xlu2 %1246 }
  0xec   : > { %v1249_v32 = vunpack.i.h.bf16 %v1247_v30  ;;  %v1248_v36 = vunpack.i.l.bf16 %v1247_v30 }
  0xee   : > { %v501_v46 = vsel %vm500_vm3, %v1248_v36, %v1249_v32 }
  0xf3   : > { %v499_v33 = vpop.permute.xlu2 %498 }
  0xf4   : > { %v502_v34 = vsel %vm500_vm3, %v1249_v32, %v499_v33 }
  0xf5   : > { %544 = vmatpush.msrb.mxu3 %v502_v34 }
  0xf6   : > { %1182 = vmatmul.msk.f32.vlgmr.msrb.gmra.mxu3 %vm366_vm2, %v1409_v35 }
  0xfb   : > { %v1257_v43 = vpop.permute.xlu2 %1256 }
  0xfc   : > { %v1258_v51 = vunpack.i.l.bf16 %v1257_v43  ;;  %v1259_v55 = vunpack.i.h.bf16 %v1257_v43 }
 0x103   : > { %v1267_v52 = vpop.permute.xlu2 %1266 }
 0x104   : > { %v1269_v56 = vunpack.i.h.bf16 %v1267_v52  ;;  %v1268_v57 = vunpack.i.l.bf16 %v1267_v52 }
 0x106   : > { %v817_v61 = vsel %vm816_vm7, %v1268_v57, %v1269_v56 }
 0x10b   : > { %v1252_v37 = vpop.permute.xlu0 %1251  ;;  %v1272_v62 = vpop.permute.xlu2 %1271 }
 0x10c   : > { %v1242_v38 = vpop.permute.xlu1 %1241  ;;  %v1254_v39 = vunpack.i.h.bf16 %v1252_v37  ;;  %v1253_v40 = vunpack.i.l.bf16 %v1252_v37  ;;  %v1274_v1 = vunpack.i.h.bf16 %v1272_v62  ;;  %v1273_v2 = vunpack.i.l.bf16 %v1272_v62 }
 0x10d   : > { %v1243_v41 = vunpack.i.l.bf16 %v1242_v38  ;;  %v1244_v47 = vunpack.i.h.bf16 %v1242_v38 }
 0x10e   : > { %643 = vmatpush.msra.mxu3 %v1254_v39  ;;  %v581_v44 = vsel %vm579_vm4, %v1253_v40, %v1254_v39  ;;  %v897_v9 = vsel %vm895_vm9, %v1273_v2, %v1274_v1 }
 0x10f   : > { %425 = vmatpush.msra.mxu2 %v1243_v41  ;;  %1186 = vmatmul.msk.f32.vlgmr.msra.gmra.mxu3 %vm366_vm2, %v572_v45 }
 0x110   : > { %1177 = vmatmul.msk.f32.vlgmr.msra.gmra.mxu2 %vm366_vm2, %v350_v42 }
 0x111   : > { %524 = vmatpush.msrb.mxu2 %v501_v46 }
 0x113   : > { %623 = vmatpush.msra.mxu2 %v581_v44  ;;  %v655_v53 = vpop.permute.xlu0 %654  ;;  %v971_v18 = vpop.permute.xlu2 %970 }
 0x114   : > { %v357_v48 = vpop.permute.xlu1 %356  ;;  %v659_v59 = vsel %vm658_vm6, %v1259_v55, %v655_v53  ;;  %v660_v60 = vsel %vm658_vm6, %v655_v53, %v1258_v51 }
 0x115   : > { %v361_v49 = vsel %vm360_vm5, %v1244_v47, %v357_v48  ;;  %v362_v50 = vsel %vm360_vm5, %v357_v48, %v1243_v41 }
 0x116   : > { %385 = vmatpush.msra.mxu0 %v361_v49  ;;  %405 = vmatpush.msra.mxu1 %v362_v50 }
 0x117   : > { %1175 = vmatmul.msk.f32.vlgmr.msra.gmra.mxu0 %vm366_vm2, %v350_v42  ;;  %1176 = vmatmul.msk.f32.vlgmr.msra.gmra.mxu1 %vm366_vm2, %v350_v42 }
 0x118   : > { %468 = vmatpush.msrb.mxu0 %v1384_v23  ;;  %488 = vmatpush.msrb.mxu1 %v1387_v26  ;;  %v450_v23 = vpop.f32.mrf.mxu3 }
 0x119   : > { %1181 = vmatmul.msk.f32.vlgmr.msrb.gmra.mxu2 %vm366_vm2, %v1409_v35 }
 0x11a   : > { %564 = vmatpush.msra.mxu0 %v499_v33  ;;  %722 = vmatpush.msrb.mxu2 %v1258_v51 }
 0x11b   : > { %v736_v63 = vpop.permute.xlu0 %735 }
 0x11c   : > { %v574_v54 = vpop.permute.xlu1 %573 }
 0x11d   : > { %v580_v58 = vsel %vm579_vm4, %v574_v54, %v1253_v40 }
 0x11e   : > { %603 = vmatpush.msra.mxu1 %v580_v58 }
 0x11f   : > { %1179 = vmatmul.msk.f32.vlgmr.msrb.gmra.mxu0 %vm366_vm2, %v346_v31  ;;  %1180 = vmatmul.msk.f32.vlgmr.msrb.gmra.mxu1 %vm366_vm2, %v346_v31 }
 0x120   : > { %682 = vmatpush.msrb.mxu0 %v659_v59  ;;  %702 = vmatpush.msrb.mxu1 %v660_v60 }
 0x121   : > { %1185 = vmatmul.msk.f32.vlgmr.msra.gmra.mxu2 %vm366_vm2, %v572_v45 }
 0x122   : > { %840 = vmatpush.msra.mxu2 %v817_v61 }
 0x123   : > { %v890_v10 = vpop.permute.xlu0 %889 }
 0x124   : > { %v1262_v0 = vpop.permute.xlu1 %1261  ;;  %v896_v14 = vsel %vm895_vm9, %v890_v10, %v1273_v2 }
 0x125   : > { %v1264_v3 = vunpack.i.h.bf16 %v1262_v0  ;;  %v1263_v4 = vunpack.i.l.bf16 %v1262_v0 }
 0x127   : > { %1183 = vmatmul.msk.f32.vlgmr.msra.gmra.mxu0 %vm366_vm2, %v1409_v35  ;;  %1184 = vmatmul.msk.f32.vlgmr.msra.gmra.mxu1 %vm366_vm2, %v572_v45  ;;  %v738_v6 = vsel %vm737_vm8, %v1263_v4, %v1264_v3  ;;  %v739_v7 = vsel %vm737_vm8, %v1264_v3, %v736_v63 }
 0x128   : > { %801 = vmatpush.msra.mxu1 %v736_v63  ;;  %761 = vmatpush.msrb.mxu3 %v738_v6 }
 0x129   : > { %1189 = vmatmul.msk.f32.vlgmr.msrb.gmra.mxu2 %vm366_vm2, %v651_v5  ;;  %781 = vmatpush.msra.mxu0 %v739_v7 }
 0x12a   : > { %939 = vmatpush.msrb.mxu2 %v897_v9  ;;  %1190 = vmatmul.msk.f32.vlgmr.msrb.gmra.mxu3 %vm366_vm2, %v730_v8 }
 0x12b   : > { %v1050_v9 = vpop.permute.xlu0 %1049 }
 0x12c   : > { %v815_v11 = vpop.permute.xlu1 %814 }
 0x12d   : > { %v818_v12 = vsel %vm816_vm7, %v1269_v56, %v815_v11 }
 0x12e   : > { %860 = vmatpush.msra.mxu3 %v818_v12 }
 0x12f   : > { %1187 = vmatmul.msk.f32.vlgmr.msrb.gmra.mxu0 %vm366_vm2, %v651_v5  ;;  %1188 = vmatmul.msk.f32.vlgmr.msrb.gmra.mxu1 %vm366_vm2, %v651_v5 }
 0x130   : > { %880 = vmatpush.msrb.mxu0 %v815_v11  ;;  %919 = vmatpush.msrb.mxu1 %v896_v14 }
 0x131   : > { %959 = vmatpush.msrb.mxu3 %v1274_v1  ;;  %1193 = vmatmul.msk.f32.vlgmr.msra.gmra.mxu2 %vm366_vm2, %v809_v13 }
 0x132   : > { %1194 = vmatmul.msk.f32.vlgmr.msra.gmra.mxu3 %vm366_vm2, %v809_v13 }
 0x134   : > { %v1277_v15 = vpop.permute.xlu1 %1276 }
 0x135   : > { %v1279_v16 = vunpack.i.h.bf16 %v1277_v15  ;;  %v1278_v17 = vunpack.i.l.bf16 %v1277_v15 }
 0x137   : > { %1191 = vmatmul.msk.f32.vlgmr.msra.gmra.mxu0 %vm366_vm2, %v730_v8  ;;  %1192 = vmatmul.msk.f32.vlgmr.msra.gmra.mxu1 %vm366_vm2, %v730_v8  ;;  %v975_v20 = vsel %vm974_vm10, %v1279_v16, %v971_v18  ;;  %v976_v21 = vsel %vm974_vm10, %v971_v18, %v1278_v17 }
 0x138   : > { %1038 = vmatpush.msra.mxu2 %v1278_v17  ;;  %998 = vmatpush.msra.mxu0 %v975_v20 }
 0x139   : > { %1197 = vmatmul.msk.f32.vlgmr.msrb.gmra.mxu2 %vm366_vm2, %v888_v19  ;;  %1018 = vmatpush.msra.mxu1 %v976_v21 }
 0x13a   : > { %1198 = vmatmul.msk.f32.vlgmr.msrb.gmra.mxu3 %vm366_vm2, %v888_v19 }
 0x13f   : > { %1195 = vmatmul.msk.f32.vlgmr.msrb.gmra.mxu0 %vm366_vm2, %v809_v13  ;;  %1196 = vmatmul.msk.f32.vlgmr.msrb.gmra.mxu1 %vm366_vm2, %v888_v19 }
 0x141   : > { %1201 = vmatmul.msk.f32.vlgmr.msra.gmra.mxu2 %vm366_vm2, %v967_v22 }
 0x147   : > { %1199 = vmatmul.msk.f32.vlgmr.msra.gmra.mxu0 %vm366_vm2, %v967_v22  ;;  %1200 = vmatmul.msk.f32.vlgmr.msra.gmra.mxu1 %vm366_vm2, %v967_v22 }
 0x179   : > { %v546_v27 = vpop.f32.mrf.mxu3 }
 0x192   : > { %v645_v31 = vpop.f32.mrf.mxu3 }
 0x193   : > { %v427_v24 = vpop.f32.mrf.mxu2 }
 0x194   : > { %v387_v25 = vpop.f32.mrf.mxu0  ;;  %v407_v26 = vpop.f32.mrf.mxu1 }
 0x195   : > { %v451_v43 = vadd.f32 %v450_v23, %v387_v25 }
 0x19c   : > { %v526_v28 = vpop.f32.mrf.mxu2  ;;  %v470_v29 = vpop.f32.mrf.mxu0 }
 0x19d   : > { %v490_v30 = vpop.f32.mrf.mxu1  ;;  %v471_v40 = vadd.f32 %v470_v29, %v407_v26  ;;  %v569_v47 = vadd.f32 %v526_v28, %v451_v43 }
 0x19e   : > { %v491_v39 = vadd.f32 %v490_v30, %v427_v24 }
 0x19f   : > { %v570_v48 = vadd.f32 %v546_v27, %v471_v40 }
 0x1a4   : > { %v625_v32 = vpop.f32.mrf.mxu2  ;;  %v566_v33 = vpop.f32.mrf.mxu0 }
 0x1a5   : > { %v605_v34 = vpop.f32.mrf.mxu1  ;;  %v571_v44 = vadd.f32 %v566_v33, %v491_v39  ;;  %v649_v51 = vadd.f32 %v625_v32, %v570_v48 }
 0x1a6   : > { %v648_v49 = vadd.f32 %v605_v34, %v569_v47 }
 0x1a7   : > { %v650_v50 = vadd.f32 %v645_v31, %v571_v44 }
 0x1ac   : > { %v724_v35 = vpop.f32.mrf.mxu2  ;;  %v684_v36 = vpop.f32.mrf.mxu0 }
 0x1ad   : > { %v704_v37 = vpop.f32.mrf.mxu1  ;;  %v763_v38 = vpop.f32.mrf.mxu3  ;;  %v729_v52 = vadd.f32 %v724_v35, %v650_v50  ;;  %v727_v53 = vadd.f32 %v684_v36, %v648_v49 }
 0x1ae   : > { %v728_v54 = vadd.f32 %v704_v37, %v649_v51 }
 0x1af   : > { %v806_v60 = vadd.f32 %v763_v38, %v727_v53 }
 0x1b4   : > { %v842_v41 = vpop.f32.mrf.mxu2  ;;  %v783_v42 = vpop.f32.mrf.mxu0 }
 0x1b5   : > { %v803_v45 = vpop.f32.mrf.mxu1  ;;  %v862_v46 = vpop.f32.mrf.mxu3  ;;  %v807_v59 = vadd.f32 %v783_v42, %v728_v54  ;;  %v885_v63 = vadd.f32 %v842_v41, %v806_v60 }
 0x1b6   : > { %v808_v57 = vadd.f32 %v803_v45, %v729_v52 }
 0x1b7   : > { %v886_v0 = vadd.f32 %v862_v46, %v807_v59 }
 0x1bc   : > { %v941_v55 = vpop.f32.mrf.mxu2  ;;  %v882_v56 = vpop.f32.mrf.mxu0 }
 0x1bd   : > { %v921_v58 = vpop.f32.mrf.mxu1  ;;  %v887_v61 = vadd.f32 %v882_v56, %v808_v57  ;;  %v961_v62 = vpop.f32.mrf.mxu3  ;;  %v965_v3 = vadd.f32 %v941_v55, %v886_v0 }
 0x1be   : > { %v964_v1 = vadd.f32 %v921_v58, %v885_v63 }
 0x1bf   : > { %v966_v2 = vadd.f32 %v961_v62, %v887_v61 }
 0x1c4   : > { %v1040_v4 = vpop.f32.mrf.mxu2  ;;  %v1000_v5 = vpop.f32.mrf.mxu0 }
 0x1c5   : > { %v1045_v6 = vadd.f32 %v1040_v4, %v966_v2  ;;  %v1043_v7 = vadd.f32 %v1000_v5, %v964_v1  ;;  %v1020_v8 = vpop.f32.mrf.mxu1 }
 0x1c6   : > { %v1044_v10 = vadd.f32 %v1020_v8, %v965_v3 }
 0x1c7   : > { %v1054_v11 = vadd.f32 %v1050_v9, %v1045_v6  ;;  %v1052_v12 = vadd.f32 %v1050_v9, %v1043_v7 }
 0x1c8   : > { %v1053_v13 = vadd.f32 %v1050_v9, %v1044_v10 }
 0x1c9   : > { %1055 = vst [vmem:[%s304_s26] sm:$0xff] %v1052_v12 }
 0x1ca   : > { %1058 = vst.msk [vmem:[%s304_s26 + $0x10] sm:$0xff] %vm1057_vm11, %v1054_v11 }
 0x1cb   : > { %1056 = vst [vmem:[%s304_s26 + $0x8] sm:$0xff] %v1053_v13 }
 0x1cc PF: > { %s16_s23 = sadd.s32 1, %s1302_s23   ;;  %s1491_s21 = smov %s1298_s22 }
 0x1cd   : > { %p13_p5 = scmp.ge.s32.totalorder %s16_s23, 4   ;;  %s1492_s22 = smov %s1494_s24 }
 0x1cf   :  { %15 = sbr.rel (!%p13_p5) target bundleno = 2 (0x2), region = 77 }

// kernel: dense_block_forward.3
= control target key start
LH: loop header
LB: loop body
LE: loop exit
PB: predicated region body
PF: predicated region fallthrough
CT: control target
= control target key end

     0   :  { %s1707_s30 = smov 0   ;;  %s1709_s10 = smov 0   ;;  %s1891_s0 = inlined_call_operand.vmem [shape: f32[2,1,8,324], index: 0, kind: input, shape index: {}]   ;;  %s1892_s1 = inlined_call_operand.vmem [shape: f32[2,1,8,324], index: 1, kind: input, shape index: {}]   ;;  %s1893_s2 = inlined_call_operand.vmem [shape: f32[1,1,324], index: 2, kind: input, shape index: {}]   ;;  %s1894_s3 = inlined_call_operand.vmem [shape: f32[8,1], index: 3, kind: input, shape index: {}]   ;;  %s1895_s4 = inlined_call_operand.vmem [shape: f32[8,1], index: 4, kind: input, shape index: {}]   ;;  %s1896_s5 = inlined_call_operand.vmem [shape: f32[8,1], index: 5, kind: input, shape index: {}]   ;;  %s1897_s6 = inlined_call_operand.vmem [shape: f32[8,1], index: 6, kind: input, shape index: {}]   ;;  %s1898_s7 = inlined_call_operand.vmem [shape: f32[72,16], index: 7, kind: input, shape index: {}]   ;;  %s1899_s8 = inlined_call_operand.vmem [shape: f32[8,1], index: 8, kind: input, shape index: {}]   ;;  %s1900_s9 = inlined_call_operand.vmem [shape: f32[2,1,8,288], index: 9, kind: output, shape index: {}]  }
   0x1   :  { %s1711_s11 = smov 0  }
   0x2 LB: > { %s31_s12 = sadd.s32 1, %s1641_s10  ;;  %p1433_p0 = scmp.ge.s32.totalorder %s1645_s11, 1  ;;  %s1645_s11 = sphi %s1711_s11, %s19_s11   ;;  %s1641_s10 = sphi %s1709_s10, %s1902_s10   ;;  %s1637_s30 = sphi %s1707_s30, %s1901_s30  }
   0x3   : > { %p33_p1 = scmp.ge.s32.totalorder %s31_s12, 2  ;;  %p332_p2 = scmp.lt.s32.totalorder %s1645_s11, 3 }
   0x5   : > { %s1904_s12 = smov (%p33_p1, %s31_s12), 0  ;;  %p333_p3 = pnand %p1433_p0, %p332_p2 }
   0x6   : > { %p389_p4 = scmp.lt.s32.totalorder (!%p333_p3), %s1637_s30, 1  ;;  %s1650_s13 = smov (!%p333_p3), 127  }
   0x7   : > { %336 = sbr.rel (%p333_p3) target bundleno = 456 (0x1c8), region = 56  ;;  %s1651_s14 = smov (!%p333_p3), 110  }
   0x8   : > { %s1652_s15 = smov (!%p333_p3), 109   ;;  %s1653_s16 = smov (!%p333_p3), 92  }
   0x9   : > { %s1654_s17 = smov (!%p333_p3), 108   ;;  %s1655_s18 = smov (!%p333_p3), 91  }
   0xa   : > { %s1656_s19 = smov (!%p333_p3), 90  }
   0xc   : > { %v466_v0 = vld [vmem:[%s1897_s6] sm:$0xff]  ;;  %v1647_v2 = vmov 0   ;;  %vm420_vm0 = vcmask 1048096   ;;  %v1648_v5 = vmov 0.0   ;;  %s1906_s30 = smov (!%p389_p4, %s1637_s30), 1  ;;  %vm460_vm1 = vcmask 556032  }
   0xd   : > { %v465_v1 = vld [vmem:[%s1896_s5] sm:$0xff]  ;;  %1502 = vset.pattern.permute.xlu1 %v1647_v2  ;;  %1501 = vset.pattern.permute.xlu0 %v1647_v2  ;;  %422 = vst.msk [vmem:[#allocation2 + $0x28] sm:$0xff] %vm420_vm0, %v1648_v5  ;;  %s1737_s21 = smul.u32 24, %s1906_s30  ;;  %s1649_s30 = smov 126   ;;  %vm529_vm2 = vcmask 130048   ;;  %v499_v57 = vld [vmem:[%s1898_s7 + $0x8] sm:$0xff] }
   0xe   : > { %477 = vperm.xlu1 %1502, %v466_v0   ;;  %469 = vperm.xlu0 %1501, %v465_v1   ;;  %v428_v3 = vld [vmem:[%s1895_s4] sm:$0xff]  ;;  %421 = vst.msk [vmem:[#allocation2 + $0x10] sm:$0xff] %vm420_vm0, %v1648_v5  ;;  %vm669_vm3 = vcmask 1031168   ;;  %vm518_vm4 = vcmask 1039360   ;;  %vm759_vm5 = vcmask 900096   ;;  %vm849_vm6 = vcmask 891904  }
   0xf   : > { %v427_v4 = vld [vmem:[%s1894_s3] sm:$0xff]  ;;  %s406_s24 = scalar_lea.vmem %s1892_s1, %s1737_s21  ;;  %s397_s29 = scalar_lea.vmem %s1891_s0, %s1737_s21  ;;  %vm939_vm7 = vcmask 883712   ;;  %vm1029_vm8 = vcmask 752640   ;;  %vm1119_vm9 = vcmask 744448   ;;  %vm1209_vm10 = vcmask 736256  }
  0x10   : > { %v462_v6 = vld [vmem:[%s406_s24] sm:$0xff]  ;;  %v463_v7 = vld [vmem:[%s406_s24 + $0x8] sm:$0xff]  ;;  %v464_v8 = vld [vmem:[%s406_s24 + $0x10] sm:$0xff]  ;;  %s419_s26 = scalar_lea.vmem %s1900_s9, %s1737_s21  ;;  %vm1297_vm11 = vcmask 261120  }
  0x11   : > { %v423_v9 = vld [vmem:[%s1893_s2] sm:$0x7]  ;;  %v425_v25 = vld [vmem:[%s397_s29 + $0x8] sm:$0xff]  ;;  %v426_v26 = vld [vmem:[%s397_s29 + $0x10] sm:$0xff] }
  0x12   : > { %v449_v15 = vperm.slane %v423_v9, 0  ;;  %v450_v16 = vperm.slane %v423_v9, 1  ;;  %v451_v17 = vperm.slane %v423_v9, 2  ;;  %v424_v24 = vld [vmem:[%s397_s29] sm:$0xff] }
  0x13   : > { %v1286_v52 = vld [vmem:[%s1899_s8] sm:$0xff] }
  0x14   : > { %v1774_v53 = vld [vmem:[%s1898_s7] sm:$0xff] }
  0x16   : > { %439 = vperm.xlu1 %1502, %v428_v3   ;;  %431 = vperm.xlu0 %1501, %v427_v4  }
  0x80   : > { %v478_v10 = vpop.permute.xlu1 %477  ;;  %v470_v11 = vpop.permute.xlu0 %469 }
  0x81   : > { %v472_v12 = vmul.f32 %v470_v11, %v462_v6  ;;  %v473_v13 = vmul.f32 %v470_v11, %v463_v7  ;;  %v474_v14 = vmul.f32 %v470_v11, %v464_v8 }
  0x83   : > { %v480_v18 = vadd.f32 %v478_v10, %v472_v12  ;;  %v481_v19 = vadd.f32 %v478_v10, %v473_v13  ;;  %v482_v20 = vadd.f32 %v478_v10, %v474_v14 }
  0x85   : > { %v483_v21 = vmax.f32 %v480_v18, 0.0  ;;  %v484_v22 = vmax.f32 %v481_v19, 0.0  ;;  %v485_v23 = vmax.f32 %v482_v20, 0.0 }
  0x87   : > { %v486_v27 = vmul.f32 %v483_v21, %v449_v15  ;;  %v1750_v28 = vmul.f32 %v484_v22, %v450_v16  ;;  %v488_v29 = vmul.f32 %v485_v23, %v451_v17 }
  0x88   : > { %v432_v30 = vpop.permute.xlu0 %431  ;;  %v440_v34 = vpop.permute.xlu1 %439 }
  0x89   : > { %v434_v31 = vmul.f32 %v432_v30, %v424_v24  ;;  %v435_v32 = vmul.f32 %v432_v30, %v425_v25  ;;  %v436_v33 = vmul.f32 %v432_v30, %v426_v26  ;;  %610 = vmatpush.msra.mxu3 %v486_v27  ;;  %v1518_v35 = vpack.i.bf16 %v1750_v28, %v486_v27  ;;  %v746_v26 = vld [vmem:[%s1898_s7 + $0x18] sm:$0xff] }
  0x8a   : > { %491 = vst.msk [vmem:[#allocation2 + $0x28] sm:$0xff] %vm460_vm1, %v488_v29 }
  0x8b   : > { %v442_v36 = vadd.f32 %v440_v34, %v434_v31  ;;  %v443_v37 = vadd.f32 %v440_v34, %v435_v32  ;;  %v444_v38 = vadd.f32 %v440_v34, %v436_v33  ;;  %1519 = vrot.lane.b32.xlu1 %v1518_v35, %s1649_s30 }
  0x8d   : > { %v445_v39 = vmax.f32 %v442_v36, 0.0  ;;  %v446_v40 = vmax.f32 %v443_v37, 0.0  ;;  %v447_v41 = vmax.f32 %v444_v38, 0.0 }
  0x8f   : > { %v455_v42 = vmul.f32 %v449_v15, %v445_v39  ;;  %v1754_v43 = vmul.f32 %v450_v16, %v446_v40  ;;  %v457_v44 = vmul.f32 %v451_v17, %v447_v41  ;;  %v656_v16 = vld [vmem:[%s1898_s7 + $0x10] sm:$0xff]  ;;  %v836_v40 = vld [vmem:[%s1898_s7 + $0x20] sm:$0xff] }
  0x91   : > { %611 = vmatpush.msra.mxu3 %v455_v42  ;;  %v1513_v45 = vpack.i.bf16 %v1754_v43, %v455_v42  ;;  %v1757_v46 = vld [vmem:[#allocation2 + $0x28] sm:$0xff]  ;;  %461 = vst.msk [vmem:[#allocation2 + $0x10] sm:$0xff] %vm460_vm1, %v457_v44  ;;  %v1543_v50 = vpack.i.bf16 %v455_v42, %v486_v27 }
  0x92   : > { %v1533_v47 = vpack.i.bf16 %v1757_v46, %v1750_v28  ;;  %1440 = vmatmul.msk.f32.vlgmr.msra.gmra.mxu3 %vm529_vm2, %v1774_v53 }
  0x93   : > { %1514 = vrot.lane.b32.xlu0 %v1513_v45, %s1650_s13 }
  0x94   : > { %1534 = vrot.lane.b32.xlu1 %v1533_v47, %s1651_s14 }
  0x98   : > { %v1762_v48 = vld [vmem:[#allocation2 + $0x10] sm:$0xff] }
  0x99   : > { %v1503_v49 = vpack.i.bf16 %v1762_v48, %v1757_v46  ;;  %v1538_v51 = vpack.i.bf16 %v1762_v48, %v1754_v43 }
  0x9b   : > { %1504 = vrot.lane.b32.xlu2 %v1503_v49, %s1650_s13  ;;  %1529 = vrot.lane.b32.xlu0 %v1503_v49, %s1649_s30 }
  0x9c   : > { %1549 = vrot.lane.b32.xlu1 %v1503_v49, %s1652_s15 }
  0xa3   : > { %1509 = vrot.lane.b32.xlu2 %v1518_v35, %s1650_s13  ;;  %1544 = vrot.lane.b32.xlu0 %v1543_v50, %s1651_s14 }
  0xa4   : > { %1564 = vrot.lane.b32.xlu1 %v1513_v45, %s1652_s15 }
  0xab   : > { %1524 = vrot.lane.b32.xlu2 %v1513_v45, %s1649_s30  ;;  %1559 = vrot.lane.b32.xlu0 %v1518_v35, %s1654_s17 }
  0xac   : > { %1579 = vrot.lane.b32.xlu1 %v1513_v45, %s1653_s16 }
  0xb3   : > { %1539 = vrot.lane.b32.xlu2 %v1538_v51, %s1651_s14  ;;  %1574 = vrot.lane.b32.xlu0 %v1518_v35, %s1653_s16 }
  0xb4   : > { %1594 = vrot.lane.b32.xlu1 %v1533_v47, %s1655_s18 }
  0xbb   : > { %1554 = vrot.lane.b32.xlu2 %v1518_v35, %s1652_s15  ;;  %1589 = vrot.lane.b32.xlu0 %v1503_v49, %s1653_s16 }
  0xbc   : > { %1609 = vrot.lane.b32.xlu1 %v1503_v49, %s1656_s19 }
  0xc3   : > { %1569 = vrot.lane.b32.xlu2 %v1513_v45, %s1654_s17  ;;  %1604 = vrot.lane.b32.xlu0 %v1543_v50, %s1655_s18 }
  0xc4   : > { %1289 = vperm.xlu1 %1502, %v1286_v52  }
  0xcb   : > { %1584 = vrot.lane.b32.xlu2 %v1503_v49, %s1654_s17  ;;  %1619 = vrot.lane.b32.xlu0 %v1513_v45, %s1656_s19 }
  0xd3   : > { %1599 = vrot.lane.b32.xlu2 %v1538_v51, %s1655_s18 }
  0xdb   : > { %1614 = vrot.lane.b32.xlu2 %v1518_v35, %s1656_s19 }
  0xf5   : > { %v1505_v54 = vpop.permute.xlu2 %1504 }
  0xf6   : > { %v1506_v55 = vunpack.i.l.bf16 %v1505_v54  ;;  %v1507_v56 = vunpack.i.h.bf16 %v1505_v54 }
  0xf8   : > { %587 = vmatpush.msra.mxu2 %v1506_v55 }
  0xfa   : > { %588 = vmatpush.msra.mxu2 %v1507_v56 }
  0xfb   : > { %1439 = vmatmul.msk.f32.vlgmr.msra.gmra.mxu2 %vm529_vm2, %v499_v57 }
  0xfd   : > { %v1520_v58 = vpop.permute.xlu1 %1519  ;;  %v1510_v59 = vpop.permute.xlu2 %1509 }
  0xfe   : > { %v1522_v60 = vunpack.i.h.bf16 %v1520_v58  ;;  %v1521_v61 = vunpack.i.l.bf16 %v1520_v58  ;;  %v1512_v62 = vunpack.i.h.bf16 %v1510_v59  ;;  %v1511_v63 = vunpack.i.l.bf16 %v1510_v59 }
 0x100   : > { %v672_v0 = vsel %vm669_vm3, %v1521_v61, %v1522_v60  ;;  %v521_v1 = vsel %vm518_vm4, %v1511_v63, %v1512_v62  ;;  %v522_v2 = vsel %vm518_vm4, %v1512_v62, %v1506_v55  ;;  %v926_v55 = vld [vmem:[%s1898_s7 + $0x28] sm:$0xff] }
 0x101   : > { %697 = vmatpush.msrb.mxu2 %v672_v0  ;;  %547 = vmatpush.msra.mxu0 %v521_v1 }
 0x102   : > { %567 = vmatpush.msra.mxu1 %v522_v2 }
 0x105   : > { %v1515_v3 = vpop.permute.xlu0 %1514  ;;  %v1525_v6 = vpop.permute.xlu2 %1524 }
 0x106   : > { %v1517_v4 = vunpack.i.h.bf16 %v1515_v3  ;;  %v1516_v5 = vunpack.i.l.bf16 %v1515_v3  ;;  %v1785_v7 = vpop.permute.xlu1 %1534  ;;  %v1527_v8 = vunpack.i.h.bf16 %v1525_v6  ;;  %v1526_v9 = vunpack.i.l.bf16 %v1525_v6  ;;  %v1016_v6 = vld [vmem:[%s1898_s7 + $0x30] sm:$0xff] }
 0x107   : > { %v1537_v10 = vunpack.i.h.bf16 %v1785_v7  ;;  %v1536_v11 = vunpack.i.l.bf16 %v1785_v7 }
 0x108   : > { %v519_v12 = vsel %vm518_vm4, %v1516_v5, %v1517_v4  ;;  %v520_v13 = vsel %vm518_vm4, %v1517_v4, %v1507_v56  ;;  %v670_v14 = vsel %vm669_vm3, %v1526_v9, %v1527_v8 }
 0x109   : > { %548 = vmatpush.msra.mxu0 %v519_v12  ;;  %568 = vmatpush.msra.mxu1 %v520_v13  ;;  %v763_v15 = vsel %vm759_vm5, %v1536_v11, %v1537_v10 }
 0x10a   : > { %698 = vmatpush.msrb.mxu2 %v670_v14  ;;  %1437 = vmatmul.msk.f32.vlgmr.msra.gmra.mxu0 %vm529_vm2, %v499_v57 }
 0x10b   : > { %630 = vmatpush.msrb.mxu0 %v1750_v28  ;;  %650 = vmatpush.msrb.mxu1 %v1757_v46 }
 0x10c   : > { %807 = vmatpush.msra.mxu2 %v763_v15  ;;  %1438 = vmatmul.msk.f32.vlgmr.msra.gmra.mxu1 %vm529_vm2, %v499_v57 }
 0x10d   : > { %1443 = vmatmul.msk.f32.vlgmr.msrb.gmra.mxu2 %vm529_vm2, %v656_v16  ;;  %631 = vmatpush.msrb.mxu0 %v1754_v43  ;;  %v1540_v17 = vpop.permute.xlu2 %1539  ;;  %v1530_v21 = vpop.permute.xlu0 %1529 }
 0x10e   : > { %651 = vmatpush.msrb.mxu1 %v1762_v48  ;;  %v1550_v18 = vpop.permute.xlu1 %1549  ;;  %v1542_v19 = vunpack.i.h.bf16 %v1540_v17  ;;  %v1541_v20 = vunpack.i.l.bf16 %v1540_v17  ;;  %v1531_v22 = vunpack.i.l.bf16 %v1530_v21  ;;  %v1532_v25 = vunpack.i.h.bf16 %v1530_v21  ;;  %v1106_v21 = vld [vmem:[%s1898_s7 + $0x38] sm:$0xff] }
 0x10f   : > { %v1551_v24 = vunpack.i.l.bf16 %v1550_v18  ;;  %v1552_v28 = vunpack.i.h.bf16 %v1550_v18 }
 0x110   : > { %v761_v23 = vsel %vm759_vm5, %v1541_v20, %v1542_v19  ;;  %737 = vmatpush.msra.mxu0 %v1531_v22  ;;  %v673_v27 = vsel %vm669_vm3, %v1522_v60, %v1531_v22  ;;  %v671_v29 = vsel %vm669_vm3, %v1527_v8, %v1532_v25 }
 0x111   : > { %808 = vmatpush.msra.mxu2 %v761_v23  ;;  %717 = vmatpush.msrb.mxu3 %v673_v27 }
 0x112   : > { %1441 = vmatmul.msk.f32.vlgmr.msrb.gmra.mxu0 %vm529_vm2, %v1774_v53 }
 0x113   : > { %917 = vmatpush.msrb.mxu2 %v1551_v24  ;;  %738 = vmatpush.msra.mxu0 %v1532_v25 }
 0x114   : > { %718 = vmatpush.msrb.mxu3 %v671_v29  ;;  %1442 = vmatmul.msk.f32.vlgmr.msrb.gmra.mxu1 %vm529_vm2, %v1774_v53 }
 0x115   : > { %1447 = vmatmul.msk.f32.vlgmr.msra.gmra.mxu2 %vm529_vm2, %v746_v26  ;;  %v1555_v30 = vpop.permute.xlu2 %1554  ;;  %1444 = vmatmul.msk.f32.vlgmr.msrb.gmra.mxu3 %vm529_vm2, %v656_v16  ;;  %v1545_v36 = vpop.permute.xlu0 %1544 }
 0x116   : > { %918 = vmatpush.msrb.mxu2 %v1552_v28  ;;  %v1565_v31 = vpop.permute.xlu1 %1564  ;;  %v1557_v32 = vunpack.i.h.bf16 %v1555_v30  ;;  %v1556_v33 = vunpack.i.l.bf16 %v1555_v30  ;;  %827 = vmatpush.msra.mxu3 %v1537_v10  ;;  %v1547_v37 = vunpack.i.h.bf16 %v1545_v36  ;;  %v1546_v38 = vunpack.i.l.bf16 %v1545_v36 }
 0x117   : > { %v1567_v34 = vunpack.i.h.bf16 %v1565_v31  ;;  %v1566_v35 = vunpack.i.l.bf16 %v1565_v31  ;;  %v1196_v31 = vld [vmem:[%s1898_s7 + $0x40] sm:$0xff] }
 0x118   : > { %v852_v39 = vsel %vm849_vm6, %v1556_v33, %v1557_v32  ;;  %828 = vmatpush.msra.mxu3 %v1542_v19  ;;  %v762_v41 = vsel %vm759_vm5, %v1546_v38, %v1536_v11  ;;  %v760_v43 = vsel %vm759_vm5, %v1547_v37, %v1541_v20  ;;  %v853_v45 = vsel %vm849_vm6, %v1557_v32, %v1551_v24 }
 0x119   : > { %877 = vmatpush.msrb.mxu0 %v852_v39  ;;  %787 = vmatpush.msra.mxu1 %v762_v41  ;;  %v850_v42 = vsel %vm849_vm6, %v1566_v35, %v1567_v34  ;;  %v851_v48 = vsel %vm849_vm6, %v1567_v34, %v1552_v28  ;;  %v613_v41 = vpop.f32.mrf.mxu3 }
 0x11a   : > { %1445 = vmatmul.msk.f32.vlgmr.msra.gmra.mxu0 %vm529_vm2, %v656_v16 }
 0x11b   : > { %878 = vmatpush.msrb.mxu0 %v850_v42  ;;  %788 = vmatpush.msra.mxu1 %v760_v43 }
 0x11c   : > { %1446 = vmatmul.msk.f32.vlgmr.msra.gmra.mxu1 %vm529_vm2, %v746_v26 }
 0x11d   : > { %1451 = vmatmul.msk.f32.vlgmr.msrb.gmra.mxu2 %vm529_vm2, %v836_v40  ;;  %v1570_v44 = vpop.permute.xlu2 %1569  ;;  %1448 = vmatmul.msk.f32.vlgmr.msra.gmra.mxu3 %vm529_vm2, %v746_v26  ;;  %v1560_v47 = vpop.permute.xlu0 %1559 }
 0x11e   : > { %v1826_v46 = vpop.permute.xlu1 %1579  ;;  %897 = vmatpush.msrb.mxu1 %v853_v45  ;;  %v1572_v49 = vunpack.i.h.bf16 %v1570_v44  ;;  %v1571_v50 = vunpack.i.l.bf16 %v1570_v44  ;;  %v1562_v51 = vunpack.i.h.bf16 %v1560_v47  ;;  %v1561_v52 = vunpack.i.l.bf16 %v1560_v47 }
 0x11f   : > { %v1582_v61 = vunpack.i.h.bf16 %v1826_v46  ;;  %v1581_v62 = vunpack.i.l.bf16 %v1826_v46 }
 0x120   : > { %898 = vmatpush.msrb.mxu1 %v851_v48  ;;  %v942_v53 = vsel %vm939_vm7, %v1561_v52, %v1562_v51  ;;  %v940_v54 = vsel %vm939_vm7, %v1571_v50, %v1572_v49 }
 0x121   : > { %967 = vmatpush.msrb.mxu3 %v942_v53  ;;  %v1030_v7 = vsel %vm1029_vm8, %v1581_v62, %v1582_v61 }
 0x122   : > { %1449 = vmatmul.msk.f32.vlgmr.msrb.gmra.mxu0 %vm529_vm2, %v836_v40 }
 0x123   : > { %968 = vmatpush.msrb.mxu3 %v940_v54 }
 0x124   : > { %1450 = vmatmul.msk.f32.vlgmr.msrb.gmra.mxu1 %vm529_vm2, %v836_v40 }
 0x125   : > { %v1585_v56 = vpop.permute.xlu2 %1584  ;;  %1452 = vmatmul.msk.f32.vlgmr.msrb.gmra.mxu3 %vm529_vm2, %v926_v55  ;;  %v1575_v60 = vpop.permute.xlu0 %1574 }
 0x126   : > { %v1837_v57 = vpop.permute.xlu1 %1594  ;;  %v1587_v58 = vunpack.i.h.bf16 %v1585_v56  ;;  %v1586_v59 = vunpack.i.l.bf16 %v1585_v56  ;;  %v1577_v63 = vunpack.i.h.bf16 %v1575_v60  ;;  %v1576_v0 = vunpack.i.l.bf16 %v1575_v60 }
 0x127   : > { %v1597_v2 = vunpack.i.h.bf16 %v1837_v57  ;;  %v1596_v3 = vunpack.i.l.bf16 %v1837_v57 }
 0x128   : > { %1007 = vmatpush.msra.mxu1 %v1586_v59  ;;  %v943_v1 = vsel %vm939_vm7, %v1562_v51, %v1586_v59  ;;  %v1032_v4 = vsel %vm1029_vm8, %v1576_v0, %v1577_v63  ;;  %v941_v5 = vsel %vm939_vm7, %v1572_v49, %v1587_v58 }
 0x129   : > { %987 = vmatpush.msra.mxu0 %v943_v1  ;;  %1057 = vmatpush.msra.mxu2 %v1032_v4  ;;  %v1123_v9 = vsel %vm1119_vm9, %v1596_v3, %v1597_v2 }
 0x12a   : > { %1008 = vmatpush.msra.mxu1 %v1587_v58 }
 0x12b   : > { %988 = vmatpush.msra.mxu0 %v941_v5  ;;  %1058 = vmatpush.msra.mxu2 %v1030_v7 }
 0x12c   : > { %1453 = vmatmul.msk.f32.vlgmr.msra.gmra.mxu0 %vm529_vm2, %v926_v55  ;;  %1454 = vmatmul.msk.f32.vlgmr.msra.gmra.mxu1 %vm529_vm2, %v926_v55 }
 0x12d   : > { %v1600_v8 = vpop.permute.xlu2 %1599  ;;  %1455 = vmatmul.msk.f32.vlgmr.msra.gmra.mxu2 %vm529_vm2, %v1016_v6  ;;  %v1590_v13 = vpop.permute.xlu0 %1589 }
 0x12e   : > { %v1610_v10 = vpop.permute.xlu1 %1609  ;;  %v1602_v11 = vunpack.i.h.bf16 %v1600_v8  ;;  %v1601_v12 = vunpack.i.l.bf16 %v1600_v8  ;;  %1167 = vmatpush.msrb.mxu2 %v1123_v9  ;;  %v1592_v14 = vunpack.i.h.bf16 %v1590_v13  ;;  %v1591_v15 = vunpack.i.l.bf16 %v1590_v13 }
 0x12f   : > { %v1611_v16 = vunpack.i.l.bf16 %v1610_v10  ;;  %v1612_v19 = vunpack.i.h.bf16 %v1610_v10 }
 0x130   : > { %v1121_v17 = vsel %vm1119_vm9, %v1601_v12, %v1602_v11  ;;  %1097 = vmatpush.msrb.mxu0 %v1591_v15  ;;  %v1033_v18 = vsel %vm1029_vm8, %v1577_v63, %v1591_v15  ;;  %v1031_v20 = vsel %vm1029_vm8, %v1582_v61, %v1592_v14 }
 0x131   : > { %1168 = vmatpush.msrb.mxu2 %v1121_v17  ;;  %1077 = vmatpush.msra.mxu3 %v1033_v18 }
 0x132   : > { %1098 = vmatpush.msrb.mxu0 %v1592_v14 }
 0x133   : > { %1277 = vmatpush.msra.mxu2 %v1611_v16  ;;  %1078 = vmatpush.msra.mxu3 %v1031_v20 }
 0x134   : > { %1457 = vmatmul.msk.f32.vlgmr.msrb.gmra.mxu0 %vm529_vm2, %v1016_v6  ;;  %1456 = vmatmul.msk.f32.vlgmr.msra.gmra.mxu3 %vm529_vm2, %v1016_v6 }
 0x135   : > { %1278 = vmatpush.msra.mxu2 %v1612_v19  ;;  %v1615_v22 = vpop.permute.xlu2 %1614  ;;  %1187 = vmatpush.msrb.mxu3 %v1597_v2  ;;  %v1605_v25 = vpop.permute.xlu0 %1604 }
 0x136   : > { %v1617_v23 = vunpack.i.h.bf16 %v1615_v22  ;;  %v1616_v24 = vunpack.i.l.bf16 %v1615_v22  ;;  %1459 = vmatmul.msk.f32.vlgmr.msrb.gmra.mxu2 %vm529_vm2, %v1106_v21  ;;  %v1607_v26 = vunpack.i.h.bf16 %v1605_v25  ;;  %v1606_v27 = vunpack.i.l.bf16 %v1605_v25  ;;  %v1290_v22 = vpop.permute.xlu1 %1289 }
 0x137   : > { %1188 = vmatpush.msrb.mxu3 %v1602_v11 }
 0x138   : > { %v1212_v28 = vsel %vm1209_vm10, %v1616_v24, %v1617_v23  ;;  %v1122_v29 = vsel %vm1119_vm9, %v1606_v27, %v1596_v3  ;;  %v1120_v30 = vsel %vm1119_vm9, %v1607_v26, %v1601_v12  ;;  %v1213_v32 = vsel %vm1209_vm10, %v1617_v23, %v1611_v16 }
 0x139   : > { %1237 = vmatpush.msra.mxu0 %v1212_v28  ;;  %1147 = vmatpush.msrb.mxu1 %v1122_v29 }
 0x13b   : > { %1148 = vmatpush.msrb.mxu1 %v1120_v30 }
 0x13c   : > { %1458 = vmatmul.msk.f32.vlgmr.msrb.gmra.mxu1 %vm529_vm2, %v1106_v21  ;;  %1460 = vmatmul.msk.f32.vlgmr.msrb.gmra.mxu3 %vm529_vm2, %v1106_v21 }
 0x13d   : > { %1257 = vmatpush.msra.mxu1 %v1213_v32  ;;  %v1620_v33 = vpop.permute.xlu0 %1619 }
 0x13e   : > { %1463 = vmatmul.msk.f32.vlgmr.msra.gmra.mxu2 %vm529_vm2, %v1196_v31  ;;  %v1622_v34 = vunpack.i.h.bf16 %v1620_v33  ;;  %v1621_v35 = vunpack.i.l.bf16 %v1620_v33 }
 0x140   : > { %v1210_v36 = vsel %vm1209_vm10, %v1621_v35, %v1622_v34  ;;  %v1211_v37 = vsel %vm1209_vm10, %v1622_v34, %v1612_v19 }
 0x141   : > { %1238 = vmatpush.msra.mxu0 %v1210_v36  ;;  %1258 = vmatpush.msra.mxu1 %v1211_v37 }
 0x142   : > { %1461 = vmatmul.msk.f32.vlgmr.msra.gmra.mxu0 %vm529_vm2, %v1196_v31 }
 0x144   : > { %1462 = vmatmul.msk.f32.vlgmr.msra.gmra.mxu1 %vm529_vm2, %v1196_v31 }
 0x17e   : > { %v590_v40 = vpop.f32.mrf.mxu2 }
 0x187   : > { %v550_v38 = vpop.f32.mrf.mxu0 }
 0x188   : > { %v614_v55 = vadd.f32 %v613_v41, %v550_v38 }
 0x189   : > { %v570_v39 = vpop.f32.mrf.mxu1 }
 0x18f   : > { %v633_v42 = vpop.f32.mrf.mxu0 }
 0x190   : > { %v700_v44 = vpop.f32.mrf.mxu2  ;;  %v634_v56 = vadd.f32 %v633_v42, %v570_v39 }
 0x191   : > { %v653_v43 = vpop.f32.mrf.mxu1  ;;  %v743_v61 = vadd.f32 %v700_v44, %v614_v55 }
 0x192   : > { %v654_v59 = vadd.f32 %v653_v43, %v590_v40 }
 0x197   : > { %v740_v46 = vpop.f32.mrf.mxu0 }
 0x198   : > { %v720_v45 = vpop.f32.mrf.mxu3  ;;  %v810_v48 = vpop.f32.mrf.mxu2  ;;  %v745_v62 = vadd.f32 %v740_v46, %v654_v59 }
 0x199   : > { %v790_v47 = vpop.f32.mrf.mxu1  ;;  %v744_v60 = vadd.f32 %v720_v45, %v634_v56 }
 0x19a   : > { %v833_v63 = vadd.f32 %v790_v47, %v743_v61 }
 0x19b   : > { %v834_v0 = vadd.f32 %v810_v48, %v744_v60 }
 0x19f   : > { %v880_v50 = vpop.f32.mrf.mxu0 }
 0x1a0   : > { %v830_v49 = vpop.f32.mrf.mxu3  ;;  %v920_v52 = vpop.f32.mrf.mxu2  ;;  %v923_v4 = vadd.f32 %v880_v50, %v833_v63 }
 0x1a1   : > { %v900_v51 = vpop.f32.mrf.mxu1  ;;  %v835_v1 = vadd.f32 %v830_v49, %v745_v62 }
 0x1a2   : > { %v924_v5 = vadd.f32 %v900_v51, %v834_v0 }
 0x1a3   : > { %v925_v8 = vadd.f32 %v920_v52, %v835_v1 }
 0x1a8   : > { %v970_v54 = vpop.f32.mrf.mxu3 }
 0x1a9   : > { %v990_v53 = vpop.f32.mrf.mxu0  ;;  %v1010_v58 = vpop.f32.mrf.mxu1  ;;  %v1013_v9 = vadd.f32 %v970_v54, %v923_v4 }
 0x1aa   : > { %v1014_v10 = vadd.f32 %v990_v53, %v924_v5  ;;  %v1015_v11 = vadd.f32 %v1010_v58, %v925_v8 }
 0x1b0   : > { %v1060_v57 = vpop.f32.mrf.mxu2 }
 0x1b1   : > { %v1100_v2 = vpop.f32.mrf.mxu0  ;;  %v1103_v12 = vadd.f32 %v1060_v57, %v1013_v9 }
 0x1b2   : > { %v1105_v14 = vadd.f32 %v1100_v2, %v1015_v11 }
 0x1b7   : > { %v1080_v3 = vpop.f32.mrf.mxu3 }
 0x1b8   : > { %v1104_v13 = vadd.f32 %v1080_v3, %v1014_v10 }
 0x1b9   : > { %v1170_v6 = vpop.f32.mrf.mxu2  ;;  %v1150_v7 = vpop.f32.mrf.mxu1 }
 0x1ba   : > { %v1193_v15 = vadd.f32 %v1150_v7, %v1103_v12  ;;  %v1194_v18 = vadd.f32 %v1170_v6, %v1104_v13 }
 0x1bf   : > { %v1190_v16 = vpop.f32.mrf.mxu3  ;;  %v1240_v17 = vpop.f32.mrf.mxu0 }
 0x1c0   : > { %v1195_v19 = vadd.f32 %v1190_v16, %v1105_v14  ;;  %v1283_v20 = vadd.f32 %v1240_v17, %v1193_v15 }
 0x1c1   : > { %v1280_v21 = vpop.f32.mrf.mxu2  ;;  %v1260_v23 = vpop.f32.mrf.mxu1 }
 0x1c2   : > { %v1292_v24 = vadd.f32 %v1290_v22, %v1283_v20  ;;  %v1284_v25 = vadd.f32 %v1260_v23, %v1194_v18  ;;  %v1285_v26 = vadd.f32 %v1280_v21, %v1195_v19 }
 0x1c4   : > { %1295 = vst [vmem:[%s419_s26] sm:$0xff] %v1292_v24  ;;  %v1293_v27 = vadd.f32 %v1290_v22, %v1284_v25  ;;  %v1294_v28 = vadd.f32 %v1290_v22, %v1285_v26 }
 0x1c6   : > { %1296 = vst [vmem:[%s419_s26 + $0x8] sm:$0xff] %v1293_v27 }
 0x1c7   : > { %1298 = vst.msk [vmem:[%s419_s26 + $0x10] sm:$0xff] %vm1297_vm11, %v1294_v28 }
 0x1c8 PF: > { %s19_s11 = sadd.s32 1, %s1645_s11   ;;  %s1901_s30 = smov %s1641_s10 }
 0x1c9   : > { %p16_p5 = scmp.ge.s32.totalorder %s19_s11, 4   ;;  %s1902_s10 = smov %s1904_s12 }
 0x1cb   :  { %18 = sbr.rel (!%p16_p5) target bundleno = 2 (0x2), region = 92 }

</bundles_post_ra>
